<compile_context>
chip_gen: v7x
topology: tpu7x:2x2x1
jax: 0.10.0
libtpu: 0.0.40
codegen_flags: <defaults>
</compile_context>

<pallas_src>
import functools

import jax
import jax.numpy as jnp
import numpy as np
from jax.experimental import pallas as pl
from jax.experimental.pallas import tpu as pltpu

_NEG_HALF_LOG_2PI = -0.5 * float(np.log(2.0 * np.pi))


def _softplus(x):
    # Numerically-stable softplus, matches torch.nn.functional.softplus.
    return jnp.logaddexp(x, 0.0)


# ----------------------------------------------------------------------------- kernel


def _vi_layer_kernel(x_ref, wmu_ref, wrho_ref, epsw_ref, bmu_ref, brho_ref,
                     epsb_ref, y_ref, lp_ref, lpv_ref, *, x_resident, w_bf16):
    k = pl.program_id(1)          # input / reduction block (arbitrary axis, innermost)
    nk = pl.num_programs(1)

    @pl.when(k == 0)
    def _init():
        # y output block is resident across the whole k sweep -> use it as the
        # accumulator directly (no separate VMEM scratch).
        y_ref[...] = jnp.zeros_like(y_ref)
        lpv_ref[...] = jnp.zeros_like(lpv_ref)

    eps_w = epsw_ref[...]
    sw = _softplus(wrho_ref[...])                 # posterior std
    w = wmu_ref[...] + sw * eps_w                 # reparameterized weight sample

    # log q(w) per element is  c - log(sw) - 0.5*eps^2  with c = -0.5*log(2*pi).
    # Accumulate only sum(log(sw) + 0.5*eps^2) as a lane vector (sublane reduce
    # only); the constant and the sign are applied once by the wrapper.
    lpv_ref[...] += jnp.sum(jnp.log(sw) + 0.5 * (eps_w * eps_w),
                            axis=0, keepdims=True)

    # x: either the k-th pre-tiled slab of a fully resident x (fetched from HBM
    # once) or the streamed (B, tk) block for this grid step.
    x = x_ref[k] if x_resident else x_ref[...]
    if w_bf16:                                    # large-B compute-bound path
        w = w.astype(jnp.bfloat16)
    y_ref[...] += jnp.dot(x, w, preferred_element_type=jnp.float32)

    @pl.when(k == nk - 1)
    def _finalize():
        sb = _softplus(brho_ref[...])             # (1, tn)
        eps_b = epsb_ref[...]
        b = bmu_ref[...] + sb * eps_b             # reparameterized bias sample
        y_ref[...] += b                           # broadcast over the batch rows
        lane = lpv_ref[...] + jnp.log(sb) + 0.5 * (eps_b * eps_b)
        lp_ref[...] = lane.reshape(lp_ref.shape)  # lane-dense (1, 1, tn) store


# ----------------------------------------------------------------------- pallas driver


def _vmem_footprint_bytes(B, I, tk, tn, x_itemsize, x_resident):
    """Rough double-buffered working-set estimate for one (tk, tn) tile config."""
    buf = 2
    w_streams = 3 * buf * tk * tn * 4            # weight_mean, weight_rho, eps_w
    b_streams = 3 * buf * tn * 4                 # bias_mean, bias_rho, eps_b
    x_bytes = buf * (B * I if x_resident else B * tk) * x_itemsize
    y_bytes = buf * B * tn * 4                   # resident f32 output/accumulator
    lp_bytes = buf * tn * 4 + tn * 4             # lp partials + lane-vector scratch
    return w_streams + b_streams + x_bytes + y_bytes + lp_bytes


def _choose_tiles(B, I, O, x_itemsize, tile_k, tile_n, x_resident,
                  cap_bytes=40 * 1024 * 1024):
    """Pick (tk, tn, resident, footprint) or None if no config fits the VMEM cap."""
    tk_cands = [tile_k] if tile_k is not None else [c for c in (512, 256, 128) if I % c == 0]
    tn_cands = [tile_n] if tile_n is not None else [c for c in (512, 256, 128) if O % c == 0]
    for tk in tk_cands:
        if I % tk:
            continue
        for tn in tn_cands:
            if O % tn:
                continue
            nj = O // tn
            if x_resident is None:
                resident = (nj >= 3) and (B * I * x_itemsize <= 4 * 1024 * 1024)
            else:
                resident = bool(x_resident)
            fp = _vmem_footprint_bytes(B, I, tk, tn, x_itemsize, resident)
            if fp <= cap_bytes:
                return tk, tn, resident, fp
    return None


def _vi_layer_pallas(x, wmu, wrho, eps_w, bmu, brho, eps_b, *, tk, tn,
                     x_resident, w_bf16, vmem_limit):
    I, O = wmu.shape
    nj, nk = O // tn, I // tk
    B = x.shape[1] if x_resident else x.shape[0]

    if x_resident:
        # x was pre-tiled by the wrapper to (nk, B, tk); keep it fully resident.
        x_spec = pl.BlockSpec((nk, B, tk), lambda j, k: (0, 0, 0))
    else:
        x_spec = pl.BlockSpec((B, tk), lambda j, k: (0, k))

    grid_spec = pltpu.PrefetchScalarGridSpec(
        num_scalar_prefetch=0,
        grid=(nj, nk),
        in_specs=[
            x_spec,
            pl.BlockSpec((tk, tn), lambda j, k: (k, j)),        # weight_mean
            pl.BlockSpec((tk, tn), lambda j, k: (k, j)),        # weight_rho
            pl.BlockSpec((tk, tn), lambda j, k: (k, j)),        # eps_w
            pl.BlockSpec((1, tn), lambda j, k: (0, j)),         # bias_mean
            pl.BlockSpec((1, tn), lambda j, k: (0, j)),         # bias_rho
            pl.BlockSpec((1, tn), lambda j, k: (0, j)),         # eps_b
        ],
        out_specs=(
            pl.BlockSpec((B, tn), lambda j, k: (0, j)),         # y (K-resident acc)
            pl.BlockSpec((1, 1, tn), lambda j, k: (j, 0, 0)),   # lp partials
        ),
        scratch_shapes=[
            pltpu.VMEM((1, tn), jnp.float32),   # lane-vector log-prob accumulator
        ],
    )

    return pl.pallas_call(
        functools.partial(_vi_layer_kernel, x_resident=x_resident, w_bf16=w_bf16),
        out_shape=(
            jax.ShapeDtypeStruct((B, O), jnp.float32),
            jax.ShapeDtypeStruct((nj, 1, tn), jnp.float32),
        ),
        grid_spec=grid_spec,
        compiler_params=pltpu.CompilerParams(
            # Output-column axis shards across TensorCores (v7x); K is a reduction.
            dimension_semantics=("parallel", "arbitrary"),
            vmem_limit_bytes=vmem_limit,
        ),
    )(x, wmu, wrho, eps_w, bmu, brho, eps_b)


# ----------------------------------------------------------------------- XLA fallback


def _forward_xla(x, weight_mean, weight_rho, bias_mean, bias_rho, eps_w, eps_b):
    """Fused XLA path (also the unsimplified reference formula)."""
    bmu = bias_mean.reshape(1, -1)
    brho = bias_rho.reshape(1, -1)
    sw = _softplus(weight_rho)
    sb = _softplus(brho)
    w = weight_mean + sw * eps_w
    b = bmu + sb * eps_b
    c = jnp.float32(_NEG_HALF_LOG_2PI)
    lp_w = c - jnp.log(sw) - (w - weight_mean) ** 2 / (2.0 * sw * sw)
    lp_b = c - jnp.log(sb) - (b - bmu) ** 2 / (2.0 * sb * sb)
    return x @ w + b, jnp.sum(lp_w) + jnp.sum(lp_b)


# ---------------------------------------------------------------------------- wrapper


def vi_layer_forward(x, weight_mean, weight_rho, bias_mean, bias_rho, key,
                     *, tile_k=None, tile_n=None, x_resident=None, use_bf16=None,
                     min_pallas_elems=256 * 256):
    """vi_layer forward. Returns (y, log_prob_scalar)."""
    B, I = x.shape
    O = weight_mean.shape[1]

    k_w, k_b = jax.random.split(key)
    eps_w = jax.random.normal(k_w, (I, O), dtype=jnp.float32)
    eps_b = jax.random.normal(k_b, (1, O), dtype=jnp.float32)

    if use_bf16 is None:
        use_bf16 = B >= 256          # fill 256-wide MXU rows before trading precision
    x_itemsize = 2 if use_bf16 else 4

    cfg = _choose_tiles(B, I, O, x_itemsize, tile_k, tile_n, x_resident)

    # Tiny, oddly-shaped, or VMEM-busting problems: fused XLA is the right tool.
    if cfg is None or I * O < min_pallas_elems:
        return _forward_xla(x, weight_mean, weight_rho, bias_mean, bias_rho,
                            eps_w, eps_b)

    tk, tn, resident, footprint = cfg
    vmem_limit = min(max(footprint + (8 << 20), 16 << 20), 48 << 20)

    x_in = x.astype(jnp.bfloat16) if use_bf16 else x.astype(jnp.float32)
    if resident:
        # Pre-tile x once in the wrapper: (B, I) -> (nk, B, tk). The kernel then
        # fetches x from HBM exactly once instead of re-streaming it per column block.
        nk = I // tk
        x_in = x_in.reshape(B, nk, tk).transpose(1, 0, 2)

    y, lp_partial = _vi_layer_pallas(
        x_in, weight_mean, weight_rho, eps_w,
        bias_mean.reshape(1, O), bias_rho.reshape(1, O), eps_b,
        tk=tk, tn=tn, x_resident=resident, w_bf16=use_bf16,
        vmem_limit=vmem_limit)

    # Final tiny cross-lane collapse + hoisted constant, done once outside.
    n_total = I * O + O
    lp = jnp.float32(n_total * _NEG_HALF_LOG_2PI) - jnp.sum(lp_partial)
    return y, lp


# ------------------------------------------------------------------------------- main


def _forward_ref_np(x, wm, wr, bm, br, eps_w, eps_b):
    """float64 numpy reference (unsimplified formula)."""
    x = np.asarray(x, np.float64)
    wm = np.asarray(wm, np.float64)
    wr = np.asarray(wr, np.float64)
    bm = np.asarray(bm, np.float64).reshape(1, -1)
    br = np.asarray(br, np.float64).reshape(1, -1)
    eps_w = np.asarray(eps_w, np.float64)
    eps_b = np.asarray(eps_b, np.float64)
    sp = lambda v: np.logaddexp(v, 0.0)
    sw, sb = sp(wr), sp(br)
    w = wm + sw * eps_w
    b = bm + sb * eps_b
    c = -0.5 * np.log(2.0 * np.pi)
    lp_w = c - np.log(sw) - (w - wm) ** 2 / (2.0 * sw * sw)
    lp_b = c - np.log(sb) - (b - bm) ** 2 / (2.0 * sb * sb)
    return x @ w + b, lp_w.sum() + lp_b.sum()


if __name__ == "__main__":
    key = jax.random.PRNGKey(0)

    def run_and_check(B, I, O, tk, tn, resident):
        kk = jax.random.fold_in(key, 7 * I + O + B)
        kx, kp, kf = jax.random.split(kk, 3)
        x = jax.random.normal(kx, (B, I), dtype=jnp.float32)
        k1, k2, k3, k4 = jax.random.split(kp, 4)
        wm = 0.3 * jax.random.normal(k1, (I, O), dtype=jnp.float32)
        wr = 0.3 * jax.random.normal(k2, (I, O), dtype=jnp.float32)
        bm = jax.random.normal(k3, (O,), dtype=jnp.float32)
        br = jax.random.normal(k4, (O,), dtype=jnp.float32)

        y, lp = vi_layer_forward(x, wm, wr, bm, br, kf,
                                 tile_k=tk, tile_n=tn, x_resident=resident)
        y, lp = jax.block_until_ready((y, lp))

        # Re-draw the exact eps the wrapper used (same split scheme) and compare
        # against the unsimplified float64 reference.
        k_w, k_b = jax.random.split(kf)
        eps_w = jax.random.normal(k_w, (I, O), dtype=jnp.float32)
        eps_b = jax.random.normal(k_b, (1, O), dtype=jnp.float32)
        y_ref, lp_ref = _forward_ref_np(x, wm, wr, bm, br, eps_w, eps_b)
        np.testing.assert_allclose(np.asarray(y), y_ref, rtol=1e-4, atol=1e-3)
        np.testing.assert_allclose(np.asarray(lp), lp_ref, rtol=2e-4, atol=1e-2)

    # Pallas path, resident-x variant: (nj, nk) = (3, 2) grid exercises
    # init / accumulate / finalize and the pre-tiled resident x read.
    run_and_check(B=8, I=256, O=384, tk=128, tn=128, resident=True)

    # Pallas path, streamed-x variant: (nj, nk) = (2, 2) grid.
    run_and_check(B=8, I=256, O=256, tk=128, tn=128, resident=False)

    # Tiny-shape XLA fallback path (dispatch threshold).
    kx, kf = jax.random.split(jax.random.fold_in(key, 999))
    xs = jax.random.normal(kx, (2, 32), dtype=jnp.float32)
    ys, lps = vi_layer_forward(xs,
                               jnp.zeros((32, 32), jnp.float32),
                               jnp.zeros((32, 32), jnp.float32),
                               jnp.ones((32,), jnp.float32),
                               jnp.ones((32,), jnp.float32), kf)
    jax.block_until_ready((ys, lps))
    assert np.isfinite(np.asarray(lps)) and np.all(np.isfinite(np.asarray(ys)))

    print("KERNEL_OK")
</pallas_src>

<mosaic_0001>
module attributes {stable_mosaic.version = 11 : i64} {
  func.func @_vi_layer_kernel(%arg0: i32, %arg1: i32, %arg2: memref<2x8x128xf32, #tpu.memory_space<vmem>>, %arg3: memref<128x128xf32, #tpu.memory_space<vmem>>, %arg4: memref<128x128xf32, #tpu.memory_space<vmem>>, %arg5: memref<128x128xf32, #tpu.memory_space<vmem>>, %arg6: memref<1x128xf32, #tpu.memory_space<vmem>>, %arg7: memref<1x128xf32, #tpu.memory_space<vmem>>, %arg8: memref<1x128xf32, #tpu.memory_space<vmem>>, %arg9: memref<8x128xf32, #tpu.memory_space<vmem>>, %arg10: memref<1x1x128xf32, #tpu.memory_space<vmem>>, %arg11: memref<1x128xf32, #tpu.memory_space<vmem>>) attributes {dimension_semantics = [#tpu.dimension_semantics<parallel>, #tpu.dimension_semantics<arbitrary>], iteration_bounds = array<i64: 3, 2>, scalar_prefetch = 0 : i64, scratch_operands = 1 : i64, tpu.core_type = #tpu.core_type<tc>, window_params = [{pipeline_mode = #tpu.pipeline_mode<synchronous>, transform_indices = @transform_0, window_bounds = array<i64: 2, 8, 128>}, {transform_indices = @transform_1, window_bounds = array<i64: 128, 128>}, {transform_indices = @transform_2, window_bounds = array<i64: 128, 128>}, {transform_indices = @transform_3, window_bounds = array<i64: 128, 128>}, {transform_indices = @transform_4, window_bounds = array<i64: 1, 128>}, {transform_indices = @transform_5, window_bounds = array<i64: 1, 128>}, {transform_indices = @transform_6, window_bounds = array<i64: 1, 128>}, {transform_indices = @transform_7, window_bounds = array<i64: 8, 128>}, {transform_indices = @transform_8, window_bounds = array<i64: 1, 1, 128>}]} {
    %c0_i32 = arith.constant 0 : i32
    %0 = arith.cmpi eq, %arg1, %c0_i32 : i32
    %1 = arith.extui %0 : i1 to i32
    %c0_i32_0 = arith.constant 0 : i32
    %2 = arith.cmpi ne, %1, %c0_i32_0 : i32
    scf.if %2 {
      %cst_21 = arith.constant 0.000000e+00 : f32
      %42 = vector.broadcast %cst_21 : f32 to vector<8x128xf32>
      %c0_22 = arith.constant 0 : index
      %c0_23 = arith.constant 0 : index
      %43 = vector.load %arg9[%c0_22, %c0_23] : memref<8x128xf32, #tpu.memory_space<vmem>>, vector<8x128xf32>
      tpu.vector_store %arg9[%c0_22, %c0_23], %42 {strides = array<i32>} : memref<8x128xf32, #tpu.memory_space<vmem>>, vector<8x128xf32>,
      %cst_24 = arith.constant 0.000000e+00 : f32
      %44 = vector.broadcast %cst_24 : f32 to vector<1x128xf32>
      %c0_25 = arith.constant 0 : index
      %c0_26 = arith.constant 0 : index
      %45 = vector.load %arg11[%c0_25, %c0_26] : memref<1x128xf32, #tpu.memory_space<vmem>>, vector<1x128xf32>
      tpu.vector_store %arg11[%c0_25, %c0_26], %44 {strides = array<i32>} : memref<1x128xf32, #tpu.memory_space<vmem>>, vector<1x128xf32>,
    } else {
    }
    %c0 = arith.constant 0 : index
    %c0_1 = arith.constant 0 : index
    %3 = vector.load %arg5[%c0, %c0_1] : memref<128x128xf32, #tpu.memory_space<vmem>>, vector<128x128xf32>
    %c0_2 = arith.constant 0 : index
    %c0_3 = arith.constant 0 : index
    %4 = vector.load %arg4[%c0_2, %c0_3] : memref<128x128xf32, #tpu.memory_space<vmem>>, vector<128x128xf32>
    %cst = arith.constant 0.000000e+00 : f32
    %5 = vector.broadcast %cst : f32 to vector<128x128xf32>
    %6 = arith.maximumf %4, %5 : vector<128x128xf32>
    %7 = vector.broadcast %cst : f32 to vector<128x128xf32>
    %8 = arith.subf %4, %7 : vector<128x128xf32>
    %9 = arith.cmpf one, %8, %8 : vector<128x128xf32>
    %10 = vector.broadcast %cst : f32 to vector<128x128xf32>
    %11 = arith.addf %4, %10 : vector<128x128xf32>
    %12 = math.absf %8 : vector<128x128xf32>
    %cst_4 = arith.constant 0.000000e+00 : f32
    %13 = vector.broadcast %cst_4 : f32 to vector<128x128xf32>
    %14 = arith.subf %13, %12 : vector<128x128xf32>
    %15 = math.exp %14 : vector<128x128xf32>
    %16 = math.log1p %15 : vector<128x128xf32>
    %17 = arith.addf %6, %16 : vector<128x128xf32>
    %18 = arith.select %9, %11, %17 : vector<128x128xi1>, vector<128x128xf32>
    %c0_5 = arith.constant 0 : index
    %c0_6 = arith.constant 0 : index
    %19 = vector.load %arg3[%c0_5, %c0_6] : memref<128x128xf32, #tpu.memory_space<vmem>>, vector<128x128xf32>
    %20 = arith.mulf %18, %3 : vector<128x128xf32>
    %21 = arith.addf %19, %20 : vector<128x128xf32>
    %c0_7 = arith.constant 0 : index
    %c0_8 = arith.constant 0 : index
    %22 = vector.load %arg11[%c0_7, %c0_8] : memref<1x128xf32, #tpu.memory_space<vmem>>, vector<1x128xf32>
    %23 = math.log %18 : vector<128x128xf32>
    %24 = arith.mulf %3, %3 : vector<128x128xf32>
    %cst_9 = arith.constant 5.000000e-01 : f32
    %25 = vector.broadcast %cst_9 : f32 to vector<128x128xf32>
    %26 = arith.mulf %25, %24 : vector<128x128xf32>
    %27 = arith.addf %23, %26 : vector<128x128xf32>
    %cst_10 = arith.constant dense<0.000000e+00> : vector<128xf32>
    %28 = vector.multi_reduction <add>, %27, %cst_10 [0] : vector<128x128xf32> to vector<128xf32>
    %29 = vector.shape_cast %28 : vector<128xf32> to vector<1x128xf32>
    %30 = arith.addf %22, %29 : vector<1x128xf32>
    %c0_11 = arith.constant 0 : index
    %c0_12 = arith.constant 0 : index
    %31 = vector.load %arg11[%c0_11, %c0_12] : memref<1x128xf32, #tpu.memory_space<vmem>>, vector<1x128xf32>
    tpu.vector_store %arg11[%c0_11, %c0_12], %30 {strides = array<i32>} : memref<1x128xf32, #tpu.memory_space<vmem>>, vector<1x128xf32>,
    %32 = arith.index_cast %arg1 : i32 to index
    %c0_13 = arith.constant 0 : index
    %c0_14 = arith.constant 0 : index
    %33 = vector.load %arg2[%32, %c0_13, %c0_14] : memref<2x8x128xf32, #tpu.memory_space<vmem>>, vector<1x8x128xf32>
    %34 = vector.shape_cast %33 : vector<1x8x128xf32> to vector<8x128xf32>
    %c0_15 = arith.constant 0 : index
    %c0_16 = arith.constant 0 : index
    %35 = vector.load %arg9[%c0_15, %c0_16] : memref<8x128xf32, #tpu.memory_space<vmem>>, vector<8x128xf32>
    %cst_17 = arith.constant dense<0.000000e+00> : vector<8x128xf32>
    %36 = tpu.matmul %34, %21, %cst_17 {dimension_numbers = #tpu.dot_dimension_numbers<[1], [0], [0], [1], [0, 0, 1, 1], [], []>} : vector<8x128xf32>, vector<128x128xf32>, vector<8x128xf32> -> vector<8x128xf32>
    %37 = arith.addf %35, %36 : vector<8x128xf32>
    %c0_18 = arith.constant 0 : index
    %c0_19 = arith.constant 0 : index
    %38 = vector.load %arg9[%c0_18, %c0_19] : memref<8x128xf32, #tpu.memory_space<vmem>>, vector<8x128xf32>
    tpu.vector_store %arg9[%c0_18, %c0_19], %37 {strides = array<i32>} : memref<8x128xf32, #tpu.memory_space<vmem>>, vector<8x128xf32>,
    %c1_i32 = arith.constant 1 : i32
    %39 = arith.cmpi eq, %arg1, %c1_i32 : i32
    %40 = arith.extui %39 : i1 to i32
    %c0_i32_20 = arith.constant 0 : i32
    %41 = arith.cmpi ne, %40, %c0_i32_20 : i32
    scf.if %41 {
      %c0_21 = arith.constant 0 : index
      %c0_22 = arith.constant 0 : index
      %42 = vector.load %arg7[%c0_21, %c0_22] : memref<1x128xf32, #tpu.memory_space<vmem>>, vector<1x128xf32>
      %cst_23 = arith.constant 0.000000e+00 : f32
      %43 = vector.broadcast %cst_23 : f32 to vector<1x128xf32>
      %44 = arith.maximumf %42, %43 : vector<1x128xf32>
      %45 = vector.broadcast %cst_23 : f32 to vector<1x128xf32>
      %46 = arith.subf %42, %45 : vector<1x128xf32>
      %47 = arith.cmpf one, %46, %46 : vector<1x128xf32>
      %48 = vector.broadcast %cst_23 : f32 to vector<1x128xf32>
      %49 = arith.addf %42, %48 : vector<1x128xf32>
      %50 = math.absf %46 : vector<1x128xf32>
      %cst_24 = arith.constant 0.000000e+00 : f32
      %51 = vector.broadcast %cst_24 : f32 to vector<1x128xf32>
      %52 = arith.subf %51, %50 : vector<1x128xf32>
      %53 = math.exp %52 : vector<1x128xf32>
      %54 = math.log1p %53 : vector<1x128xf32>
      %55 = arith.addf %44, %54 : vector<1x128xf32>
      %56 = arith.select %47, %49, %55 : vector<1x128xi1>, vector<1x128xf32>
      %c0_25 = arith.constant 0 : index
      %c0_26 = arith.constant 0 : index
      %57 = vector.load %arg8[%c0_25, %c0_26] : memref<1x128xf32, #tpu.memory_space<vmem>>, vector<1x128xf32>
      %c0_27 = arith.constant 0 : index
      %c0_28 = arith.constant 0 : index
      %58 = vector.load %arg6[%c0_27, %c0_28] : memref<1x128xf32, #tpu.memory_space<vmem>>, vector<1x128xf32>
      %59 = arith.mulf %56, %57 : vector<1x128xf32>
      %60 = arith.addf %58, %59 : vector<1x128xf32>
      %c0_29 = arith.constant 0 : index
      %c0_30 = arith.constant 0 : index
      %61 = vector.load %arg9[%c0_29, %c0_30] : memref<8x128xf32, #tpu.memory_space<vmem>>, vector<8x128xf32>
      %62 = vector.broadcast %60 : vector<1x128xf32> to vector<8x128xf32>
      %63 = arith.addf %61, %62 : vector<8x128xf32>
      %c0_31 = arith.constant 0 : index
      %c0_32 = arith.constant 0 : index
      %64 = vector.load %arg9[%c0_31, %c0_32] : memref<8x128xf32, #tpu.memory_space<vmem>>, vector<8x128xf32>
      tpu.vector_store %arg9[%c0_31, %c0_32], %63 {strides = array<i32>} : memref<8x128xf32, #tpu.memory_space<vmem>>, vector<8x128xf32>,
      %c0_33 = arith.constant 0 : index
      %c0_34 = arith.constant 0 : index
      %65 = vector.load %arg11[%c0_33, %c0_34] : memref<1x128xf32, #tpu.memory_space<vmem>>, vector<1x128xf32>
      %66 = math.log %56 : vector<1x128xf32>
      %67 = arith.addf %65, %66 : vector<1x128xf32>
      %68 = arith.mulf %57, %57 : vector<1x128xf32>
      %cst_35 = arith.constant 5.000000e-01 : f32
      %69 = vector.broadcast %cst_35 : f32 to vector<1x128xf32>
      %70 = arith.mulf %69, %68 : vector<1x128xf32>
      %71 = arith.addf %67, %70 : vector<1x128xf32>
      %72 = vector.shape_cast %71 : vector<1x128xf32> to vector<1x1x128xf32>
      %c0_36 = arith.constant 0 : index
      %c0_37 = arith.constant 0 : index
      %c0_38 = arith.constant 0 : index
      %73 = vector.load %arg10[%c0_36, %c0_37, %c0_38] : memref<1x1x128xf32, #tpu.memory_space<vmem>>, vector<1x1x128xf32>
      tpu.vector_store %arg10[%c0_36, %c0_37, %c0_38], %72 {strides = array<i32>} : memref<1x1x128xf32, #tpu.memory_space<vmem>>, vector<1x1x128xf32>,
    } else {
    }
    return
  }
  func.func @transform_0(%arg0: i32, %arg1: i32) -> (i32, i32, i32) {
    %c0_i32 = arith.constant 0 : i32
    %c0_i32_0 = arith.constant 0 : i32
    %c0_i32_1 = arith.constant 0 : i32
    %c0_i32_2 = arith.constant 0 : i32
    return %c0_i32, %c0_i32_0, %c0_i32_1 : i32, i32, i32
  }
  func.func @transform_1(%arg0: i32, %arg1: i32) -> (i32, i32) {
    %c0_i32 = arith.constant 0 : i32
    return %arg1, %arg0 : i32, i32
  }
  func.func @transform_2(%arg0: i32, %arg1: i32) -> (i32, i32) {
    %c0_i32 = arith.constant 0 : i32
    return %arg1, %arg0 : i32, i32
  }
  func.func @transform_3(%arg0: i32, %arg1: i32) -> (i32, i32) {
    %c0_i32 = arith.constant 0 : i32
    return %arg1, %arg0 : i32, i32
  }
  func.func @transform_4(%arg0: i32, %arg1: i32) -> (i32, i32) {
    %c0_i32 = arith.constant 0 : i32
    %c0_i32_0 = arith.constant 0 : i32
    return %c0_i32, %arg0 : i32, i32
  }
  func.func @transform_5(%arg0: i32, %arg1: i32) -> (i32, i32) {
    %c0_i32 = arith.constant 0 : i32
    %c0_i32_0 = arith.constant 0 : i32
    return %c0_i32, %arg0 : i32, i32
  }
  func.func @transform_6(%arg0: i32, %arg1: i32) -> (i32, i32) {
    %c0_i32 = arith.constant 0 : i32
    %c0_i32_0 = arith.constant 0 : i32
    return %c0_i32, %arg0 : i32, i32
  }
  func.func @transform_7(%arg0: i32, %arg1: i32) -> (i32, i32) {
    %c0_i32 = arith.constant 0 : i32
    %c0_i32_0 = arith.constant 0 : i32
    return %c0_i32, %arg0 : i32, i32
  }
  func.func @transform_8(%arg0: i32, %arg1: i32) -> (i32, i32, i32) {
    %c0_i32 = arith.constant 0 : i32
    %c0_i32_0 = arith.constant 0 : i32
    %c0_i32_1 = arith.constant 0 : i32
    return %arg0, %c0_i32, %c0_i32_0 : i32, i32, i32
  }
}

</mosaic_0001>

<bundles_post_ra>
// kernel: tpu_custom_call.1
= control target key start
LH: loop header
LB: loop body
LE: loop exit
PB: predicated region body
PF: predicated region fallthrough
CT: control target
= control target key end

     0   :  { %s2874_s0 = inlined_call_operand.hbm [shape: f32[2,8,128], index: 0, kind: input, shape index: {}]   ;;  %s2875_s1 = inlined_call_operand.hbm [shape: f32[256,384], index: 1, kind: input, shape index: {}]   ;;  %s2876_s2 = inlined_call_operand.hbm [shape: f32[256,384], index: 2, kind: input, shape index: {}]   ;;  %s2877_s3 = inlined_call_operand.hbm [shape: f32[256,384], index: 3, kind: input, shape index: {}]   ;;  %s2878_s4 = inlined_call_operand.vmem [shape: f32[1,384], index: 4, kind: input, shape index: {}]   ;;  %s2879_s5 = inlined_call_operand.vmem [shape: f32[1,384], index: 5, kind: input, shape index: {}]   ;;  %s2880_s6 = inlined_call_operand.vmem [shape: f32[1,384], index: 6, kind: input, shape index: {}]   ;;  %s2881_s7 = inlined_call_operand.hbm [shape: f32[8,384], index: 7, kind: output, shape index: {0}]   ;;  %s2882_s8 = inlined_call_operand.hbm [shape: f32[3,1,128], index: 8, kind: output, shape index: {1}]  }
   0x1   :  { %2908 = sst [smem:[#allocation29_spill]] %s2875_s1 }
   0x2   :  { %2909 = sst [smem:[#allocation30_spill]] %s2876_s2 }
   0x3   :  { %2910 = sst [smem:[#allocation31_spill]] %s2879_s5 }
   0x4   :  { %2911 = sst [smem:[#allocation32_spill]] %s2880_s6 }
   0x5   :  { %2912 = sst [smem:[#allocation33_spill]] %s2881_s7 }
   0x6   :  { %2913 = sst [smem:[#allocation34_spill]] %s2882_s8 }
   0x7   :  { %14 = vsyncpa [#allocation4], 0 }
   0x8   :  { %15 = vsyncpa [#allocation7], 0 }
   0x9   :  { %17 = vsyncpa [#allocation7 + $0x1], 0 }
   0xa   :  { %18 = vsyncpa [#allocation10], 0 }
   0xb   :  { %20 = vsyncpa [#allocation10 + $0x1], 0 }
   0xc   :  { %21 = vsyncpa [#allocation5], 0 }
   0xd   :  { %23 = vsyncpa [#allocation5 + $0x1], 0 }
   0xe   :  { %24 = vsyncpa [#allocation13], 0 }
   0xf   :  { %26 = vsyncpa [#allocation13 + $0x1], 0  ;;  %s2010_s27 = smov 0   ;;  %s2012_s28 = smov 0  }
  0x10   :  { %s2014_s29 = smov 0   ;;  %s2016_s30 = smov 0  }
  0x11   :  { %s2018_s9 = smov 0   ;;  %s2020_s10 = smov 0  }
  0x12   :  { %s2022_s11 = smov 0   ;;  %s2024_s12 = smov 0  }
  0x13   :  { %s2026_s13 = smov 0   ;;  %s2028_s14 = smov 0  }
  0x14   :  { %s2030_s15 = smov 0  }
  0x15 LB: > { %2914 = sst [smem:[#allocation19_spill]] %s1910_s27  ;;  %s41_s16 = sadd.s32 1, %s1942_s13  ;;  %s1950_s15 = sphi %s2030_s15, %s32_s15   ;;  %s1946_s14 = sphi %s2028_s14, %s2995_s14   ;;  %s1942_s13 = sphi %s2026_s13, %s2994_s13   ;;  %s1938_s12 = sphi %s2024_s12, %s2993_s12   ;;  %s1934_s11 = sphi %s2022_s11, %s2992_s11   ;;  %s1930_s10 = sphi %s2020_s10, %s3000_s10   ;;  %s1926_s9 = sphi %s2018_s9, %s2999_s9   ;;  %s1922_s30 = sphi %s2016_s30, %s2998_s30   ;;  %s1918_s29 = sphi %s2014_s29, %s2990_s29   ;;  %s1914_s28 = sphi %s2012_s28, %s2997_s28   ;;  %s1910_s27 = sphi %s2010_s27, %s2996_s27  }
  0x16   : > { %2915 = sst [smem:[#allocation20_spill]] %s1918_s29  ;;  %s44_s17 = sadd.s32 1, %s1946_s14 }
  0x17   : > { %2916 = sst [smem:[#allocation21_spill]] %s1934_s11  ;;  %p42_p0 = scmp.ge.s32.totalorder %s41_s16, 2 }
  0x18   : > { %2917 = sst [smem:[#allocation22_spill]] %s1942_s13  ;;  %s74_s18 = sadd.s32 1, %s1930_s10 }
  0x19   : > { %2918 = sst [smem:[#allocation23_spill]] %s1946_s14  ;;  %p81_p1 = scmp.ne.s32.totalorder %s1930_s10, %s1926_s9 }
  0x1a   : > { %p82_p2 = scmp.eq.s32.totalorder %s1950_s15, 0  ;;  %s3002_s16 = smov (%p42_p0, %s41_s16), 0 }
  0x1b   : > { %2919 = sst [smem:[#allocation24_spill]] %s3002_s16  ;;  %s3004_s17 = smov (!%p42_p0, %s44_s17), %s1946_s14 }
  0x1c   : > { %s69_s19 = ssub.s32 %s1942_s13, %s3002_s16  ;;  %p2076_p3 = por %p82_p2, %p81_p1 }
  0x1d   : > { %p46_p4 = scmp.ge.s32.totalorder %s3004_s17, 3  ;;  %p1469_p5 = scmp.lt.s32.totalorder %s1950_s15, 6 }
  0x1e   : > { %s310_s21 = sand.u32 1, %s1950_s15   ;;  %s2888_s24 = sand.u32 1, %s1930_s10  }
  0x1f   : > { %s3006_s17 = smov (%p46_p4, %s3004_s17), 0  ;;  %s2093_s25 = sshll.u32 %s2888_s24, 7 }
  0x20   : > { %2921 = sst [smem:[#allocation25_spill]] %s3006_s17  ;;  %s2086_s22 = ssub.s32 %s1946_s14, %s3006_s17 }
  0x21   : > { %s71_s23 = sor.u32 %s2086_s22, %s69_s19  ;;  %s1430_s26 = smul.u32 48, %s1942_s13 }
  0x22   : > { %p72_p7 = scmp.eq.s32.totalorder %s71_s23, 0  ;;  %s314_s11 = scalar_lea.vmem [#allocation6], %s2093_s25 }
  0x23   : > { %s320_s8 = sadd.s32 %s1946_s14, %s1430_s26  ;;  %s323_s17 = sshll.u32 %s314_s11, 4  ;;  %s2109_s17 = int_to_ptr.vmem [resolvable:$true] %s323_s17 }
  0x24   : > { %s2097_s16 = scalar_select %p72_p7, %s1930_s10, %s74_s18  }
  0x25   : > { %s2100_s7 = sshll.u32 %s320_s8, 7  ;;  %s2923_s1 = sld [smem:[#allocation29_spill]] }
  0x26   : > { %2922 = sst [smem:[#allocation26_spill]] %s2097_s16  ;;  %p2115_p8 = pnand %p1469_p5, %p2076_p3 }
  0x27   : > { %s2119_s8 = scalar_lea.sflag [#allocation7], %s310_s21 }
  0x28   : > { %s2924_s18 = scalar_select %p2115_p8, 1, 0 }
  0x29   : > { %p2125_p10 = pneg %p2115_p8 }
  0x2b   : > { %s2107_s19 = scalar_lea.hbm %s2923_s1, %s2100_s7  ;;  %s1675_s23 = scalar_lea.hbm %s2923_s1, 12288 }
  0x2c   : > { %s1670_s11 = scalar_lea.hbm %s2107_s19, 2048  ;;  %p1676_p13 = scmp.lt.u32.totalorder %s2107_s19, %s2923_s1 }
  0x2d   : > { %p1671_p9 = scmp.ne.s32.totalorder %s2107_s19, %s1670_s11  ;;  %p1677_p0 = scmp.lt.u32.totalorder %s1675_s23, %s1670_s11 }
  0x2e   : > { %s2925_s5 = scalar_select %p2125_p10, 1, 0 }
  0x2f   : > { %p1673_p11 = pnand %p2125_p10, %p1671_p9  ;;  %p1678_p1 = por %p1677_p0, %p1676_p13 }
  0x30   : > { %p1679_p2 = scmp.lt.u32.totalorder %s1670_s11, %s2107_s19 }
  0x31   : > { %p1674_p12 = pneg %p1673_p11 }
  0x32   : > { %p1680_p3 = por %p1679_p2, %p1678_p1 }
  0x34   : > { %p1681_p4 = pnand %p1680_p3, %p1674_p12 }
  0x36   : > { %1684 = shalt.err (!%p1681_p4)
}
  0x37   : > { %s1685_s21 = scalar_lea.vmem %s2109_s17, 2048  ;;  %s1952_s6 = smov [#allocation6]  }
  0x38   : > { %p1686_p5 = scmp.ne.s32.totalorder %s2109_s17, %s1685_s21  ;;  %s1690_s20 = sshll.u32 %s1952_s6, 4  ;;  %s1691_s20 = int_to_ptr.vmem [resolvable:$false] %s1690_s20 }
  0x39   : > { %s1692_s24 = scalar_lea.vmem %s1691_s20, 4096  ;;  %p1693_p11 = scmp.lt.s32.totalorder %s2109_s17, %s1691_s20 }
  0x3a   : > { %p1688_p7 = pnand %p1686_p5, %p2125_p10  ;;  %p1694_p6 = scmp.lt.s32.totalorder %s1692_s24, %s1685_s21 }
  0x3c   : > { %p1689_p9 = pneg %p1688_p7  ;;  %p1695_p13 = por %p1694_p6, %p1693_p11 }
  0x3e   : > { %p1696_p0 = pnand %p1695_p13, %p1689_p9 }
  0x40   : > { %1699 = shalt.err (!%p1696_p0)
}
  0x41   : > { %s2889_s11 = smov 384   ;;  %s2891_s23 = smov 128  }
  0x42   : > { %s2893_s26 = smov 8   ;;  %s2153_s21 = sadd.s32 4294967295, %s1950_s15  }
  0x43   : > { %1454 = dma.hbm_to_vmem [thread:$0]  (!%p2115_p8), %s2107_s19, 2048, %s2109_s17, %s2119_s8, %s2889_s11, %s2891_s23, %s2893_s26  }
  0x44   : > { %s1324_s6 = sadd.s32 4294967294, %s1950_s15   ;;  %p87_p6 = scmp.ne.s32.totalorder %s1926_s9, %s1922_s30 }
  0x45   : > { %p2898_p12 = scmp.eq.s32.totalorder %s2153_s21, 0  ;;  %s234_s20 = sadd.s32 1, %s1918_s29 }
  0x46   : > { %p2926_p1 = scmp.eq.s32.totalorder %s2086_s22, 0  ;;  %p244_p3 = scmp.ne.s32.totalorder %s1918_s29, %s1914_s28 }
  0x47   : > { %p2167_p2 = por %p2898_p12, %p87_p6  ;;  %p245_p4 = scmp.eq.s32.totalorder %s2153_s21, 5 }
  0x48   : > { %s2163_s24 = scalar_select %p2926_p1, %s1918_s29, %s234_s20  }
  0x49   : > { %s2928_s1 = scalar_select %p2167_p2, 1, 0 }
  0x4a   : > { %2927 = sst [smem:[#allocation27_spill]] %s2163_s24  ;;  %p250_p5 = scmp.ne.s32.totalorder %s1914_s28, %s1910_s27 }
  0x4b   : > { %p251_p7 = scmp.eq.s32.totalorder %s1324_s6, 5  ;;  %p1325_p9 = scmp.ge.s32.totalorder %s1950_s15, 1 }
  0x4c   : > { %p2177_p11 = por %p245_p4, %p244_p3  ;;  %p284_p13 = scmp.lt.s32.totalorder %s1950_s15, 7 }
  0x4d   : > { %p2182_p0 = por %p251_p7, %p250_p5  ;;  %s1956_s19 = smov [#allocation3]  }
  0x4e   : > { %s2929_s30 = scalar_select %p2177_p11, 1, 0 }
  0x4f   : > { %s2930_s17 = scalar_select %p2182_p0, 1, 0 }
  0x50   : > { %p2186_p6 = pnand %p1325_p9, %p284_p13  ;;  %s296_s20 = sshll.u32 %s1956_s19, 4  ;;  %s2192_s20 = int_to_ptr.vmem [resolvable:$true] %s296_s20 }
  0x51   : > { %2931 = sst [smem:[#allocation28_spill]] %s2930_s17  ;;  %s2933_s2 = sld [smem:[#allocation30_spill]] }
  0x52   : > { %s2932_s22 = scalar_select %p2186_p6, 1, 0 }
  0x53   : > { %p1447_p1 = pneg %p2186_p6  ;;  %s337_s26 = scalar_lea.vmem [#allocation8], %s2093_s25 }
  0x54   : > { %s346_s14 = sshll.u32 %s337_s26, 4  ;;  %s2207_s14 = int_to_ptr.vmem [resolvable:$true] %s346_s14 }
  0x55   : > { %p2203_p3 = pnand %p1447_p1, %p2898_p12 }
  0x57   : > { %s2198_s23 = scalar_lea.hbm %s2933_s2, %s2100_s7  ;;  %s1705_s16 = scalar_lea.hbm %s2933_s2, 12288 }
  0x58   : > { %s2934_s13 = scalar_select %p2203_p3, 1, 0 }
  0x59   : > { %s1700_s19 = scalar_lea.hbm %s2198_s23, 2048  ;;  %p1706_p9 = scmp.lt.u32.totalorder %s2198_s23, %s2933_s2 }
  0x5a   : > { %p1701_p4 = scmp.ne.s32.totalorder %s2198_s23, %s1700_s19  ;;  %p1707_p13 = scmp.lt.u32.totalorder %s1705_s16, %s1700_s19 }
  0x5b   : > { %p1709_p12 = scmp.lt.u32.totalorder %s1700_s19, %s2198_s23 }
  0x5c   : > { %p1703_p5 = pnand %p1701_p4, %p2125_p10  ;;  %p1708_p1 = por %p1707_p13, %p1706_p9 }
  0x5e   : > { %p1704_p7 = pneg %p1703_p5  ;;  %p1710_p0 = por %p1709_p12, %p1708_p1 }
  0x60   : > { %p1711_p11 = pnand %p1710_p0, %p1704_p7 }
  0x62   : > { %1714 = shalt.err (!%p1711_p11)
}
  0x63   : > { %s1715_s26 = scalar_lea.vmem %s2207_s14, 2048  ;;  %s1957_s11 = smov [#allocation8]  }
  0x64   : > { %p1716_p4 = scmp.ne.s32.totalorder %s2207_s14, %s1715_s26  ;;  %s1720_s6 = sshll.u32 %s1957_s11, 4  ;;  %s1721_s6 = int_to_ptr.vmem [resolvable:$false] %s1720_s6 }
  0x65   : > { %s1722_s29 = scalar_lea.vmem %s1721_s6, 4096  ;;  %p1723_p6 = scmp.lt.s32.totalorder %s2207_s14, %s1721_s6 }
  0x66   : > { %p1718_p5 = pnand %p1716_p4, %p2125_p10  ;;  %p1724_p3 = scmp.lt.s32.totalorder %s1722_s29, %s1715_s26 }
  0x68   : > { %p1719_p2 = pneg %p1718_p5  ;;  %p1725_p9 = por %p1724_p3, %p1723_p6 }
  0x6a   : > { %p1726_p13 = pnand %p1725_p9, %p1719_p2 }
  0x6c   : > { %1729 = shalt.err (!%p1726_p13)
}
  0x6d   : > { %s2935_s16 = smov 8   ;;  %s2936_s24 = smov 128  }
  0x6e   : > { %s2937_s19 = smov 384   ;;  %s1730_s11 = scalar_lea.hbm %s2874_s0, 256 }
  0x6f   : > { %1457 = dma.hbm_to_vmem [thread:$0]  (!%p2115_p8), %s2198_s23, 2048, %s2207_s14, %s2119_s8, %s2937_s19, %s2936_s24, %s2935_s16  }
  0x70   : > { %p1731_p12 = scmp.ne.s32.totalorder %s2874_s0, %s1730_s11  ;;  %p2938_p2 = scmp.ne.s32.totalorder %s2934_s13, 0 }
  0x71   : > { %p1737_p3 = scmp.lt.u32.totalorder %s1730_s11, %s2874_s0 }
  0x72   : > { %p1732_p11 = pneg %p2938_p2 }
  0x74   : > { %p1733_p0 = pnand %p1732_p11, %p1731_p12 }
  0x76   : > { %p1734_p6 = pneg %p1733_p0 }
  0x78   : > { %p1739_p7 = pnand %p1737_p3, %p1734_p6 }
  0x7a   : > { %1742 = shalt.err (!%p1739_p7)
}
  0x7b   : > { %s1743_s14 = scalar_lea.vmem %s2192_s20, 256  ;;  %p1751_p9 = scmp.lt.s32.totalorder %s2192_s20, %s2192_s20 }
  0x7c   : > { %p1744_p1 = scmp.ne.s32.totalorder %s2192_s20, %s1743_s14  ;;  %p1752_p13 = scmp.lt.s32.totalorder %s1743_s14, %s1743_s14 }
  0x7e   : > { %p1746_p4 = pnand %p1744_p1, %p1732_p11  ;;  %p1753_p8 = por %p1752_p13, %p1751_p9 }
  0x80   : > { %p1747_p5 = pneg %p1746_p4 }
  0x82   : > { %p1754_p10 = pnand %p1753_p8, %p1747_p5 }
  0x84   : > { %1757 = shalt.err (!%p1754_p10)
}
  0x85   : > { %1450 = dma.hbm_to_vmem [thread:$0]  (!%p2938_p2), %s2874_s0, 256, %s2192_s20, [#allocation4], %s2936_s24, %s2936_s24, %s2935_s16  }
  0x86   : > { %s2262_s17 = scalar_lea.hbm %s2877_s3, %s2100_s7  ;;  %s360_s13 = scalar_lea.vmem [#allocation9], %s2093_s25 }
  0x87   : > { %s369_s11 = sshll.u32 %s360_s13, 4  ;;  %s2939_s6 = sand.u32 1, %s1930_s10   ;;  %s2265_s11 = int_to_ptr.vmem [resolvable:$true] %s369_s11 }
  0x88   : > { %s2269_s26 = scalar_lea.sflag [#allocation10], %s2939_s6  ;;  %s1758_s29 = scalar_lea.hbm %s2262_s17, 2048 }
  0x89   : > { %p1759_p8 = scmp.ne.s32.totalorder %s2262_s17, %s1758_s29  ;;  %p2940_p10 = scmp.ne.s32.totalorder %s2925_s5, 0 }
  0x8a   : > { %s1763_s7 = scalar_lea.hbm %s2877_s3, 12288  ;;  %p1764_p11 = scmp.lt.u32.totalorder %s2262_s17, %s2877_s3 }
  0x8b   : > { %p1761_p12 = pnand %p1759_p8, %p2940_p10  ;;  %p1765_p0 = scmp.lt.u32.totalorder %s1763_s7, %s1758_s29 }
  0x8c   : > { %p1767_p3 = scmp.lt.u32.totalorder %s1758_s29, %s2262_s17 }
  0x8d   : > { %p1762_p2 = pneg %p1761_p12  ;;  %p1766_p6 = por %p1765_p0, %p1764_p11 }
  0x8f   : > { %p1768_p7 = por %p1767_p3, %p1766_p6 }
  0x91   : > { %p1769_p1 = pnand %p1768_p7, %p1762_p2 }
  0x93   : > { %1772 = shalt.err (!%p1769_p1)
}
  0x94   : > { %s1773_s25 = scalar_lea.vmem %s2265_s11, 2048  ;;  %s1958_s8 = smov [#allocation9]  }
  0x95   : > { %p1774_p4 = scmp.ne.s32.totalorder %s2265_s11, %s1773_s25  ;;  %s1778_s23 = sshll.u32 %s1958_s8, 4  ;;  %s1779_s23 = int_to_ptr.vmem [resolvable:$false] %s1778_s23 }
  0x96   : > { %s1780_s13 = scalar_lea.vmem %s1779_s23, 4096  ;;  %p1781_p13 = scmp.lt.s32.totalorder %s2265_s11, %s1779_s23 }
  0x97   : > { %p1776_p5 = pnand %p1774_p4, %p2940_p10  ;;  %p1782_p8 = scmp.lt.s32.totalorder %s1780_s13, %s1773_s25 }
  0x99   : > { %p1777_p9 = pneg %p1776_p5  ;;  %p1783_p12 = por %p1782_p8, %p1781_p13 }
  0x9b   : > { %p1784_p11 = pnand %p1783_p12, %p1777_p9 }
  0x9d   : > { %1787 = shalt.err (!%p1784_p11)
}
  0x9e   : > { %p2941_p2 = scmp.ne.s32.totalorder %s2924_s18, 0  ;;  %p2942_p10 = scmp.ne.s32.totalorder %s2932_s22, 0 }
  0x9f   : > { %p2943_p0 = scmp.eq.s32.totalorder (!%p2942_p10), %s2153_s21, 0 }
  0xa0   : > { %1460 = dma.hbm_to_vmem [thread:$0]  (!%p2941_p2), %s2262_s17, 2048, %s2265_s11, %s2269_s26, %s2937_s19, %s2936_s24, %s2935_s16  }
  0xa1   : > { %399 = sbr.rel (%p2942_p10) target bundleno = 589 (0x24d), region = 48 }
  0xa8   : > { %1889 = dma.done.wait (%p2943_p0), [#allocation4], 256   ;;  %p2944_p6 = pmov %p2943_p0 }
  0xa9   : > { %s405_s18 = sand.u32 1, %s2153_s21   ;;  %s407_s5 = sand.u32 1, %s1926_s9  }
  0xaa   : > { %1891 = vsyncadd (%p2944_p6), [#allocation4], 4294967040  ;;  %s1342_s6 = sshll.u32 %s407_s5, 7  ;;  %s406_s29 = scalar_lea.sflag [#allocation7], %s405_s18 }
  0xab   : > { %s2304_s20 = scalar_lea.vmem [#allocation6], %s1342_s6  ;;  %p2945_p3 = scmp.ne.s32.totalorder %s2928_s1, 0 }
  0xad   : > { %1893 = dma.done.wait (%p2945_p3), %s406_s29, 4096  }
  0xae   : > { %1895 = vsyncadd (%p2945_p3), %s406_s29, 4294963200  ;;  %s2310_s22 = scalar_lea.vmem [#allocation8], %s1342_s6  ;;  %s424_s16 = scalar_lea.sflag [#allocation10], %s407_s5 }
  0xaf   : > { %s2312_s24 = scalar_lea.vmem [#allocation9], %s1342_s6 }
  0xb0   : > { %1897 = dma.done.wait (%p2945_p3), %s424_s16, 2048  }
  0xb1   : > { %1899 = vsyncadd (%p2945_p3), %s424_s16, 4294965248  ;;  %s2319_s21 = sand.u32 1, %s1914_s28   ;;  %p486_p7 = scmp.lt.s32.totalorder %s1938_s12, 2 }
  0xb2   : > { %s1345_s19 = sshll.u32 %s2319_s21, 3  ;;  %s2946_s2 = sld [smem:[#allocation31_spill]] }
  0xb3   : > { %s2324_s17 = scalar_select %p486_p7, %s1938_s12, 2 }
  0xb4   : > { %s2947_s23 = sld [smem:[#allocation32_spill]]  ;;  %s2338_s18 = scalar_lea.vmem [#allocation11], %s1345_s19 }
  0xb5   : > { %s488_s14 = scalar_lea.vmem %s2878_s4, %s2324_s17  ;;  %s482_s5 = scalar_lea.vmem [#allocation12], %s2319_s21 }
  0xb6   : > { %s2948_s6 = sld [smem:[#allocation21_spill]] }
  0xb8   : > { %s491_s27 = scalar_lea.vmem %s2946_s2, %s2324_s17 }
  0xba   : > { %s494_s13 = scalar_lea.vmem %s2947_s23, %s2324_s17 }
  0xbc   : > { %p1346_p1 = scmp.ne.s32.totalorder %s2948_s6, 0 }
  0xbd   : > { %v1959_v0 = vmov (!%p1346_p1), 0.0  }
  0xbe   : > { %498 = sbr.rel (%p1346_p1) target bundleno = 197 (0xc5), region = 68  ;;  %499 = vst [vmem:[%s2338_s18] sm:$0xff] (!%p1346_p1), %v1959_v0  ;;  %500 = vst [vmem:[#allocation2] sm:$0x1] (!%p1346_p1), %v1959_v0 }
  0xc5 PF: > { %v2344_v1 = vld [vmem:[%s2310_s22] sm:$0xff]  ;;  %v1960_v2 = vmov 0.0|0.0   ;;  %v2348_v3 = vld [vmem:[%s2310_s22 + $0x8] sm:$0xff]  ;;  %vm1961_vm0 = vmmov 0   ;;  %v1962_v5 = vmov 0.0   ;;  %v2353_v7 = vld [vmem:[%s2310_s22 + $0x10] sm:$0xff] }
  0xc6   : > { %1406 = vmatprep.subr.bf16.mxu0 %v1960_v2  ;;  %v581_v4 = vand.u32 2147483647, %v2344_v1  ;;  %1403 = vmatprep.mubr.msk.f32.mxu0 %vm1961_vm0, %v1962_v5  ;;  %v582_v6 = vand.u32 2147483647, %v2348_v3  ;;  %v2356_v9 = vld [vmem:[%s2310_s22 + $0x18] sm:$0xff]  ;;  %v2361_v15 = vld [vmem:[%s2310_s22 + $0x20] sm:$0xff]  ;;  %vm549_vm1 = vcmp.ne.f32.partialorder %v2344_v1, %v2344_v1  ;;  %vm550_vm2 = vcmp.ne.f32.partialorder %v2348_v3, %v2348_v3 }
  0xc7   : > { %v583_v12 = vand.u32 2147483647, %v2353_v7  ;;  %v584_v13 = vand.u32 2147483647, %v2356_v9  ;;  %v2364_v18 = vld [vmem:[%s2310_s22 + $0x28] sm:$0xff]  ;;  %v2369_v23 = vld [vmem:[%s2310_s22 + $0x30] sm:$0xff]  ;;  %vm551_vm5 = vcmp.ne.f32.partialorder %v2353_v7, %v2353_v7  ;;  %vm552_vm6 = vcmp.ne.f32.partialorder %v2356_v9, %v2356_v9 }
  0xc8   : > { %v597_v8 = vsub.f32 0.0, %v581_v4  ;;  %v598_v10 = vsub.f32 0.0, %v582_v6  ;;  %v585_v21 = vand.u32 2147483647, %v2361_v15  ;;  %v586_v22 = vand.u32 2147483647, %v2364_v18 }
  0xc9   : > { %v599_v16 = vsub.f32 0.0, %v583_v12  ;;  %v600_v17 = vsub.f32 0.0, %v584_v13  ;;  %v2372_v27 = vld [vmem:[%s2310_s22 + $0x38] sm:$0xff]  ;;  %v587_v28 = vand.u32 2147483647, %v2369_v23  ;;  %v2377_v34 = vld [vmem:[%s2310_s22 + $0x40] sm:$0xff]  ;;  %vm553_vm9 = vcmp.ne.f32.partialorder %v2361_v15, %v2361_v15 }
  0xca   : > { %v613_v11 = vmul.f32 1.442695, %v597_v8  ;;  %v615_v14 = vmul.f32 1.442695, %v598_v10  ;;  %v601_v24 = vsub.f32 0.0, %v585_v21  ;;  %v602_v25 = vsub.f32 0.0, %v586_v22 }
  0xcb   : > { %v617_v19 = vmul.f32 1.442695, %v599_v16  ;;  %v619_v20 = vmul.f32 1.442695, %v600_v17  ;;  %v603_v30 = vsub.f32 0.0, %v587_v28  ;;  %v2380_v38 = vld [vmem:[%s2312_s24] sm:$0xff]  ;;  %vm554_vm12 = vcmp.ne.f32.partialorder %v2364_v18, %v2364_v18 }
  0xcc   : > { %1568 = vpow2.f32 %v613_v11  ;;  %v621_v26 = vmul.f32 1.442695, %v601_v24  ;;  %v623_v29 = vmul.f32 1.442695, %v602_v25  ;;  %v588_v31 = vand.u32 2147483647, %v2372_v27 }
  0xcd   : > { %1570 = vpow2.f32 %v615_v14  ;;  %v625_v33 = vmul.f32 1.442695, %v603_v30  ;;  %v589_v40 = vand.u32 2147483647, %v2377_v34  ;;  %v533_v42 = vmax.f32 %v2344_v1, 0.0  ;;  %v2392_v50 = vld [vmem:[%s2310_s22 + $0x48] sm:$0xff] }
  0xce   : > { %1572 = vpow2.f32 %v617_v19  ;;  %v604_v39 = vsub.f32 0.0, %v588_v31  ;;  %v2386_v44 = vmul.f32 %v2380_v38, %v2380_v38  ;;  %v534_v46 = vmax.f32 %v2348_v3, 0.0  ;;  %s2979_s29 = sld [smem:[#allocation21_spill]] }
  0xcf   : > { %1574 = vpow2.f32 %v619_v20  ;;  %v535_v52 = vmax.f32 %v2353_v7, 0.0  ;;  %v536_v53 = vmax.f32 %v2356_v9, 0.0  ;;  %v537_v55 = vmax.f32 %v2361_v15, 0.0 }
  0xd0   : > { %1576 = vpow2.f32 %v621_v26  ;;  %v627_v56 = vmul.f32 1.442695, %v604_v39  ;;  %v605_v57 = vsub.f32 0.0, %v589_v40  ;;  %v590_v61 = vand.u32 2147483647, %v2392_v50 }
  0xd1   : > { %1578 = vpow2.f32 %v623_v29  ;;  %v538_v10 = vmax.f32 %v2364_v18, 0.0  ;;  %vm555_vm14 = vcmp.ne.f32.partialorder %v2369_v23, %v2369_v23  ;;  %vm556_vm15 = vcmp.ne.f32.partialorder %v2372_v27, %v2372_v27 }
  0xd2   : > { %1580 = vpow2.f32 %v625_v33  ;;  %v629_v14 = vmul.f32 1.442695, %v605_v57  ;;  %v606_v26 = vsub.f32 0.0, %v590_v61 }
  0xd4   : > { %p1348_p4 = scmp.ne.s32.totalorder %s2979_s29, 1 }
  0xd6   : > { %v1569_v32 = vpop.eup %1568 }
  0xd7   : > { %v1571_v35 = vpop.eup %1570  ;;  %v645_v36 = vadd.f32 1.0, %v1569_v32  ;;  %v648_v43 = vmul.f32 -0.5, %v1569_v32  ;;  %v651_v47 = vand.u32 2147483647, %v1569_v32 }
  0xd8   : > { %v654_v37 = vadd.f32 1.0, %v1571_v35  ;;  %v1573_v41 = vpop.eup %1572  ;;  %v657_v48 = vmul.f32 -0.5, %v1571_v35  ;;  %v660_v51 = vand.u32 2147483647, %v1571_v35 }
  0xd9   : > { %1582 = vlog2.f32 %v645_v36  ;;  %v2388_v45 = vpop.eup %1574  ;;  %v663_v49 = vadd.f32 1.0, %v1573_v41  ;;  %v649_v59 = vadd.f32 1.0, %v648_v43  ;;  %v666_v60 = vmul.f32 -0.5, %v1573_v41  ;;  %v502_v43 = vld [vmem:[%s2312_s24 + $0x8] sm:$0xff] }
  0xda   : > { %1584 = vlog2.f32 %v654_v37  ;;  %v672_v54 = vadd.f32 1.0, %v2388_v45  ;;  %v1577_v58 = vpop.eup %1576  ;;  %vm2405_vm3 = vcmp.lt.f32.partialorder %v651_v47, 0.0004427343  ;;  %v658_v0 = vadd.f32 1.0, %v657_v48 }
  0xdb   : > { %1586 = vlog2.f32 %v663_v49  ;;  %v2401_v62 = vpop.eup %1578  ;;  %v675_v4 = vmul.f32 -0.5, %v2388_v45  ;;  %v681_v5 = vadd.f32 1.0, %v1577_v58  ;;  %vm2410_vm4 = vcmp.lt.f32.partialorder %v660_v51, 0.0004427343 }
  0xdc   : > { %1588 = vlog2.f32 %v672_v54  ;;  %v669_v8 = vand.u32 2147483647, %v1573_v41  ;;  %v690_v11 = vadd.f32 1.0, %v2401_v62  ;;  %v678_v12 = vand.u32 2147483647, %v2388_v45  ;;  %v2417_v16 = vpop.eup %1580 }
  0xdd   : > { %1590 = vlog2.f32 %v681_v5  ;;  %v684_v13 = vmul.f32 -0.5, %v1577_v58  ;;  %v650_v17 = vmul.f32 %v1569_v32, %v649_v59  ;;  %v667_v19 = vadd.f32 1.0, %v666_v60 }
  0xde   : > { %1592 = vlog2.f32 %v690_v11  ;;  %v693_v20 = vmul.f32 -0.5, %v2401_v62  ;;  %v659_v22 = vmul.f32 %v1571_v35, %v658_v0  ;;  %v676_v24 = vadd.f32 1.0, %v675_v4  ;;  %v822_v0 = vld [vmem:[%s2304_s20 + $0x8] sm:$0xff]  ;;  %v503_v11 = vld [vmem:[%s2312_s24 + $0x10] sm:$0xff] }
  0xdf   : > { %v699_v25 = vadd.f32 1.0, %v2417_v16  ;;  %vm2425_vm7 = vcmp.lt.f32.partialorder %v669_v8, 0.0004427343  ;;  %v687_v31 = vand.u32 2147483647, %v1577_v58  ;;  %1594 = vpow2.f32 %v627_v56 }
  0xe0   : > { %vm2429_vm8 = vcmp.lt.f32.partialorder %v678_v12, 0.0004427343  ;;  %v685_v35 = vadd.f32 1.0, %v684_v13  ;;  %1596 = vpow2.f32 %v629_v14  ;;  %v668_v37 = vmul.f32 %v1573_v41, %v667_v19 }
  0xe1   : > { %v694_v39 = vadd.f32 1.0, %v693_v20  ;;  %1598 = vlog2.f32 %v699_v25  ;;  %v677_v49 = vmul.f32 %v2388_v45, %v676_v24  ;;  %v631_v51 = vmul.f32 1.442695, %v606_v26  ;;  %v821_v45 = vld [vmem:[%s2304_s20] sm:$0xff]  ;;  %v824_v24 = vld [vmem:[%s2304_s20 + $0x18] sm:$0xff] }
  0xe2   : > { %vm2445_vm10 = vcmp.lt.f32.partialorder %v687_v31, 0.0004427343  ;;  %v696_v59 = vand.u32 2147483647, %v2401_v62  ;;  %v686_v61 = vmul.f32 %v1577_v58, %v685_v35  ;;  %v702_v63 = vmul.f32 -0.5, %v2417_v16  ;;  %v2499_v35 = vld [vmem:[%s2312_s24 + $0x20] sm:$0xff] }
  0xe3   : > { %v1583_v21 = vpop.eup %1582  ;;  %1600 = vpow2.f32 %v631_v51  ;;  %v2513_v51 = vld [vmem:[%s2310_s22 + $0x58] sm:$0xff] }
  0xe4   : > { %v1585_v28 = vpop.eup %1584  ;;  %v647_v29 = vmul.f32 0.6931472, %v1583_v21  ;;  %vm2473_vm11 = vcmp.lt.f32.partialorder %v696_v59, 0.0004427343  ;;  %v823_v21 = vld [vmem:[%s2304_s20 + $0x10] sm:$0xff] }
  0xe5   : > { %v656_v32 = vmul.f32 0.6931472, %v1585_v28  ;;  %v1587_v40 = vpop.eup %1586 }
  0xe6   : > { %v653_v36 = vsel %vm2405_vm3, %v650_v17, %v647_v29  ;;  %v1589_v54 = vpop.eup %1588  ;;  %v665_v56 = vmul.f32 0.6931472, %v1587_v40  ;;  %v903_v40 = vmul.f32 %v502_v43, %v502_v43 }
  0xe7   : > { %v662_v47 = vsel %vm2410_vm4, %v659_v22, %v656_v32  ;;  %v789_v48 = vadd.f32 %v653_v36, %v533_v42  ;;  %v674_v60 = vmul.f32 0.6931472, %v1589_v54  ;;  %v1591_v6 = vpop.eup %1590  ;;  %v705_v32 = vand.u32 2147483647, %v2417_v16  ;;  %v2502_v36 = vld [vmem:[%s2312_s24 + $0x28] sm:$0xff] }
  0xe8   : > { %v790_v41 = vadd.f32 %v662_v47, %v534_v46  ;;  %v671_v5 = vsel %vm2425_vm7, %v668_v37, %v665_v56  ;;  %v683_v17 = vmul.f32 0.6931472, %v1591_v6  ;;  %v826_v54 = vld [vmem:[%s2304_s20 + $0x28] sm:$0xff]  ;;  %vm558_vm4 = vcmp.ne.f32.partialorder %v2392_v50, %v2392_v50 }
  0xe9   : > { %v805_v42 = vsel %vm549_vm1, %v2344_v1, %v789_v48  ;;  %v695_v1 = vmul.f32 %v2401_v62, %v694_v39  ;;  %v680_v58 = vsel %vm2429_vm8, %v677_v49, %v674_v60  ;;  %v791_v12 = vadd.f32 %v671_v5, %v535_v52  ;;  %v2510_v49 = vld [vmem:[%s2310_s22 + $0x50] sm:$0xff] }
  0xea   : > { %v806_v46 = vsel %vm550_vm2, %v2348_v3, %v790_v41  ;;  %v837_v4 = vmul.f32 %v805_v42, %v2380_v38  ;;  %v1593_v3 = vpop.eup %1592  ;;  %v504_v38 = vld [vmem:[%s2312_s24 + $0x18] sm:$0xff]  ;;  %v792_v14 = vadd.f32 %v680_v58, %v536_v53  ;;  %v689_v26 = vsel %vm2445_vm10, %v686_v61, %v683_v17 }
  0xeb   : > { %v838_v8 = vmul.f32 %v806_v46, %v502_v43  ;;  %v807_v20 = vsel %vm551_vm5, %v2353_v7, %v791_v12  ;;  %v692_v52 = vmul.f32 0.6931472, %v1593_v3  ;;  %v2484_v22 = vpop.eup %1594  ;;  %v703_v7 = vadd.f32 1.0, %v702_v63  ;;  %v825_v43 = vld [vmem:[%s2304_s20 + $0x20] sm:$0xff] }
  0xec   : > { %v853_v13 = vadd.f32 %v837_v4, %v821_v45  ;;  %v808_v53 = vsel %vm552_vm6, %v2356_v9, %v792_v14  ;;  %v839_v25 = vmul.f32 %v807_v20, %v503_v11  ;;  %v2493_v28 = vpop.eup %1596  ;;  %1602 = vlog2.f32 %v805_v42 }
  0xed   : > { %v854_v19 = vadd.f32 %v838_v8, %v822_v0  ;;  %v840_v30 = vmul.f32 %v808_v53, %v504_v38  ;;  %v698_v31 = vsel %vm2473_vm11, %v695_v1, %v692_v52  ;;  %v1599_v33 = vpop.eup %1598  ;;  %v793_v37 = vadd.f32 %v689_v26, %v537_v55 }
  0xee   : > { %v855_v9 = vadd.f32 %v839_v25, %v823_v21  ;;  %v794_v39 = vadd.f32 %v698_v31, %v538_v10  ;;  %1604 = vlog2.f32 %v806_v46  ;;  %v708_v48 = vadd.f32 1.0, %v2484_v22  ;;  %v2539_v61 = vpop.eup %1600  ;;  %v2563_v31 = vld [vmem:[%s2312_s24 + $0x30] sm:$0xff] }
  0xef   : > { %v1407_v29 = vpack.c.bf16 %v854_v19, %v853_v13  ;;  %v856_v47 = vadd.f32 %v840_v30, %v824_v24  ;;  %v809_v55 = vsel %vm553_vm9, %v2361_v15, %v793_v37  ;;  %v704_v41 = vmul.f32 %v2417_v16, %v703_v7 }
  0xf0   : > { %v2524_v10 = vsel %vm554_vm12, %v2364_v18, %v794_v39  ;;  %v717_v56 = vadd.f32 1.0, %v2493_v28  ;;  %v841_v59 = vmul.f32 %v809_v55, %v2499_v35  ;;  %v701_v45 = vmul.f32 0.6931472, %v1599_v33 }
  0xf1   : > { %1408 = vmatpush3.bf16.msra.mxu0 %v1407_v29  ;;  %v1410_v57 = vpack.c.bf16 %v856_v47, %v855_v9  ;;  %v842_v42 = vmul.f32 %v2524_v10, %v2502_v36  ;;  %1606 = vlog2.f32 %v807_v20  ;;  %vm2533_vm13 = vcmp.lt.f32.partialorder %v705_v32, 0.0004427343  ;;  %v2571_v9 = vld [vmem:[%s2310_s22 + $0x60] sm:$0xff] }
  0xf2   : > { %1409 = vmatprep.subr.bf16.mxu0 %v1960_v2  ;;  %v591_v18 = vand.u32 2147483647, %v2510_v49  ;;  %v592_v60 = vand.u32 2147483647, %v2513_v51  ;;  %v904_v16 = vmul.f32 %v503_v11, %v503_v11  ;;  %v857_v63 = vadd.f32 %v841_v59, %v825_v43 }
  0xf3   : > { %v858_v46 = vadd.f32 %v842_v42, %v826_v54  ;;  %1608 = vlog2.f32 %v708_v48  ;;  %v539_v0 = vmax.f32 %v2369_v23, 0.0  ;;  %v711_v4 = vmul.f32 -0.5, %v2484_v22 }
  0xf4   : > { %1610 = vlog2.f32 %v717_v56  ;;  %v905_v5 = vmul.f32 %v504_v38, %v504_v38  ;;  %v707_v6 = vsel %vm2533_vm13, %v704_v41, %v701_v45  ;;  %v720_v8 = vmul.f32 -0.5, %v2493_v28 }
  0xf5   : > { %1411 = vmatpush3.bf16.msra.mxu0 %v1410_v57  ;;  %v1413_v1 = vpack.c.bf16 %v858_v46, %v857_v63  ;;  %v726_v11 = vadd.f32 1.0, %v2539_v61  ;;  %v607_v58 = vsub.f32 0.0, %v591_v18  ;;  %v608_v12 = vsub.f32 0.0, %v592_v60  ;;  %v2595_v18 = vld [vmem:[%s2312_s24 + $0x38] sm:$0xff] }
  0xf6   : > { %1412 = vmatprep.subr.bf16.mxu0 %v1960_v2  ;;  %v918_v3 = vmul.f32 0.5, %v2386_v44  ;;  %v919_v13 = vmul.f32 0.5, %v903_v40  ;;  %v2549_v14 = vmul.f32 0.5, %v904_v16  ;;  %v1603_v17 = vpop.eup %1602  ;;  %1612 = vlog2.f32 %v808_v53 }
  0xf7   : > { %v712_v38 = vadd.f32 1.0, %v711_v4  ;;  %v795_v62 = vadd.f32 %v707_v6, %v539_v0  ;;  %v714_v20 = vand.u32 2147483647, %v2484_v22  ;;  %v721_v21 = vadd.f32 1.0, %v720_v8  ;;  %v828_v8 = vld [vmem:[%s2304_s20 + $0x38] sm:$0xff] }
  0xf8   : > { %v1605_v19 = vpop.eup %1604  ;;  %v723_v44 = vand.u32 2147483647, %v2493_v28  ;;  %1614 = vlog2.f32 %v726_v11  ;;  %v2556_v52 = vmul.f32 0.5, %v905_v5  ;;  %v729_v53 = vmul.f32 -0.5, %v2539_v61 }
  0xf9   : > { %1414 = vmatpush3.bf16.msra.mxu0 %v1413_v1  ;;  %v633_v24 = vmul.f32 1.442695, %v607_v58  ;;  %v635_v25 = vmul.f32 1.442695, %v608_v12  ;;  %v871_v26 = vmul.f32 0.6931472, %v1603_v17  ;;  %1616 = vlog2.f32 %v809_v55 }
  0xfa   : > { %1415 = vmatprep.subr.bf16.mxu0 %v1960_v2  ;;  %v540_v7 = vmax.f32 %v2372_v27, 0.0  ;;  %v873_v30 = vmul.f32 0.6931472, %v1605_v19  ;;  %v713_v32 = vmul.f32 %v2484_v22, %v712_v38  ;;  %v811_v33 = vsel %vm555_vm14, %v2369_v23, %v795_v62  ;;  %v2580_v22 = vld [vmem:[%s2310_s22 + $0x68] sm:$0xff]  ;;  %v2609_v58 = vld [vmem:[%s2312_s24 + $0x40] sm:$0xff] }
  0xfb   : > { %v1607_v29 = vpop.eup %1606  ;;  %1618 = vpow2.f32 %v633_v24  ;;  %vm2573_vm0 = vcmp.lt.f32.partialorder %v714_v20, 0.0004427343  ;;  %v541_v40 = vmax.f32 %v2377_v34, 0.0  ;;  %v722_v47 = vmul.f32 %v2493_v28, %v721_v21 }
  0xfc   : > { %1620 = vpow2.f32 %v635_v25  ;;  %vm2583_vm1 = vcmp.lt.f32.partialorder %v723_v44, 0.0004427343  ;;  %v730_v43 = vadd.f32 1.0, %v729_v53  ;;  %v843_v54 = vmul.f32 %v811_v33, %v2563_v31 }
  0xfd   : > { %v1609_v37 = vpop.eup %1608  ;;  %1622 = vlog2.f32 %v2524_v10  ;;  %v732_v56 = vand.u32 2147483647, %v2539_v61  ;;  %v593_v28 = vand.u32 2147483647, %v2571_v9  ;;  %v934_v57 = vadd.f32 %v918_v3, %v871_v26  ;;  %v827_v10 = vld [vmem:[%s2304_s20 + $0x30] sm:$0xff] }
  0xfe   : > { %v1611_v48 = vpop.eup %1610  ;;  %v710_v23 = vmul.f32 0.6931472, %v1609_v37  ;;  %v935_v59 = vadd.f32 %v919_v13, %v873_v30  ;;  %v594_v45 = vand.u32 2147483647, %v2580_v22  ;;  %v875_v15 = vmul.f32 0.6931472, %v1607_v29 }
  0xff   : > { %v719_v41 = vmul.f32 0.6931472, %v1611_v48  ;;  %v609_v63 = vsub.f32 0.0, %v593_v28  ;;  %v542_v0 = vmax.f32 %v2392_v50, 0.0  ;;  %vm557_vm2 = vcmp.ne.f32.partialorder %v2377_v34, %v2377_v34  ;;  %v830_v48 = vld [vmem:[%s2304_s20 + $0x48] sm:$0xff] }
 0x100   : > { %v716_v42 = vsel %vm2573_vm0, %v713_v32, %v710_v23  ;;  %v1613_v46 = vpop.eup %1612  ;;  %v731_v4 = vmul.f32 %v2539_v61, %v730_v43  ;;  %v859_v11 = vadd.f32 %v843_v54, %v827_v10  ;;  %vm2611_vm3 = vcmp.lt.f32.partialorder %v732_v56, 0.0004427343  ;;  %v2649_v43 = vld [vmem:[%s2310_s22 + $0x70] sm:$0xff]  ;;  %v2652_v54 = vld [vmem:[%s2310_s22 + $0x78] sm:$0xff]  ;;  %s1347_s22 = sshll.u32 %s2979_s29, 3 }
 0x101   : > { %v796_v60 = vadd.f32 %v716_v42, %v540_v7  ;;  %v725_v16 = vsel %vm2583_vm1, %v722_v47, %v719_v41  ;;  %v637_v3 = vmul.f32 1.442695, %v609_v63  ;;  %v950_v13 = vadd.f32 %v935_v59, %v934_v57  ;;  %v829_v7 = vld [vmem:[%s2304_s20 + $0x40] sm:$0xff]  ;;  %s974_s16 = scalar_lea.vmem [#allocation3], %s1347_s22 }
 0x102   : > { %v797_v5 = vadd.f32 %v725_v16, %v541_v40  ;;  %v1615_v1 = vpop.eup %1614  ;;  %v610_v38 = vsub.f32 0.0, %v594_v45  ;;  %v877_v19 = vmul.f32 0.6931472, %v1613_v46  ;;  %v907_v32 = vmul.f32 %v2502_v36, %v2502_v36 }
 0x103   : > { %v812_v6 = vsel %vm556_vm15, %v2372_v27, %v796_v60  ;;  %v728_v61 = vmul.f32 0.6931472, %v1615_v1  ;;  %v1617_v62 = vpop.eup %1616  ;;  %v936_v27 = vadd.f32 %v2549_v14, %v875_v15  ;;  %1624 = vpow2.f32 %v637_v3 }
 0x104   : > { %v844_v17 = vmul.f32 %v812_v6, %v2595_v18  ;;  %v813_v20 = vsel %vm557_vm2, %v2377_v34, %v797_v5  ;;  %v906_v14 = vmul.f32 %v2499_v35, %v2499_v35  ;;  %1626 = vlog2.f32 %v811_v33  ;;  %v2633_v34 = vld [vmem:[%s2312_s24 + $0x48] sm:$0xff] }
 0x105   : > { %v2621_v21 = vpop.eup %1618  ;;  %v734_v53 = vsel %vm2611_vm3, %v731_v4, %v728_v61  ;;  %v845_v24 = vmul.f32 %v813_v20, %v2609_v58  ;;  %v639_v40 = vmul.f32 1.442695, %v610_v38  ;;  %v937_v47 = vadd.f32 %v2556_v52, %v877_v19 }
 0x106   : > { %v860_v44 = vadd.f32 %v844_v17, %v828_v8  ;;  %v2628_v25 = vpop.eup %1620  ;;  %v798_v26 = vadd.f32 %v734_v53, %v542_v0  ;;  %v735_v29 = vadd.f32 1.0, %v2621_v21  ;;  %v951_v35 = vadd.f32 %v950_v13, %v936_v27 }
 0x107   : > { %v1623_v30 = vpop.eup %1622  ;;  %v744_v39 = vadd.f32 1.0, %v2628_v25  ;;  %v861_v55 = vadd.f32 %v845_v24, %v829_v7  ;;  %v738_v36 = vmul.f32 -0.5, %v2621_v21  ;;  %v879_v52 = vmul.f32 0.6931472, %v1617_v62 }
 0x108   : > { %v1416_v37 = vpack.c.bf16 %v860_v44, %v859_v11  ;;  %v814_v33 = vsel %vm558_vm4, %v2392_v50, %v798_v26  ;;  %1628 = vlog2.f32 %v735_v29  ;;  %v922_v41 = vmul.f32 0.5, %v906_v14 }
 0x109   : > { %1630 = vlog2.f32 %v812_v6  ;;  %v846_v23 = vmul.f32 %v814_v33, %v2633_v34  ;;  %v908_v50 = vmul.f32 %v2563_v31, %v2563_v31  ;;  %v747_v28 = vmul.f32 -0.5, %v2628_v25 }
 0x10a   : > { %1417 = vmatpush3.bf16.msra.mxu0 %v1416_v37  ;;  %1632 = vlog2.f32 %v744_v39  ;;  %v923_v57 = vmul.f32 0.5, %v907_v32  ;;  %v595_v59 = vand.u32 2147483647, %v2649_v43  ;;  %v596_v42 = vand.u32 2147483647, %v2652_v54  ;;  %v511_v32 = vld [vmem:[%s2312_s24 + $0x50] sm:$0xff] }
 0x10b   : > { %1418 = vmatprep.subr.bf16.mxu0 %v1960_v2  ;;  %v862_v56 = vadd.f32 %v846_v23, %v830_v48  ;;  %1634 = vpow2.f32 %v639_v40  ;;  %v952_v10 = vadd.f32 %v951_v35, %v937_v47  ;;  %v881_v45 = vmul.f32 0.6931472, %v1623_v30  ;;  %v512_v23 = vld [vmem:[%s2312_s24 + $0x58] sm:$0xff] }
 0x10c   : > { %v739_v60 = vadd.f32 1.0, %v738_v36  ;;  %v938_v63 = vadd.f32 %v922_v41, %v879_v52  ;;  %v741_v46 = vand.u32 2147483647, %v2621_v21  ;;  %v611_v0 = vsub.f32 0.0, %v595_v59  ;;  %v831_v52 = vld [vmem:[%s2304_s20 + $0x50] sm:$0xff] }
 0x10d   : > { %v1419_v15 = vpack.c.bf16 %v862_v56, %v861_v55  ;;  %v2660_v16 = vpop.eup %1624  ;;  %v612_v31 = vsub.f32 0.0, %v596_v42  ;;  %v909_v4 = vmul.f32 %v2595_v18, %v2595_v18  ;;  %v924_v5 = vmul.f32 0.5, %v908_v50  ;;  %v832_v42 = vld [vmem:[%s2304_s20 + $0x58] sm:$0xff] }
 0x10e   : > { %v748_v1 = vadd.f32 1.0, %v747_v28  ;;  %v753_v6 = vadd.f32 1.0, %v2660_v16  ;;  %v1627_v8 = vpop.eup %1626  ;;  %1636 = vlog2.f32 %v813_v20  ;;  %v750_v11 = vand.u32 2147483647, %v2628_v25 }
 0x10f   : > { %1420 = vmatpush3.bf16.msra.mxu0 %v1419_v15  ;;  %v641_v12 = vmul.f32 1.442695, %v611_v0  ;;  %v643_v3 = vmul.f32 1.442695, %v612_v31  ;;  %v939_v13 = vadd.f32 %v923_v57, %v881_v45  ;;  %v543_v17 = vmax.f32 %v2510_v49, 0.0 }
 0x110   : > { %1421 = vmatprep.subr.bf16.mxu0 %v1960_v2  ;;  %v740_v61 = vmul.f32 %v2621_v21, %v739_v60  ;;  %1638 = vlog2.f32 %v753_v6  ;;  %v953_v38 = vadd.f32 %v952_v10, %v938_v63  ;;  %vm2670_vm5 = vcmp.lt.f32.partialorder %v741_v46, 0.0004427343 }
 0x111   : > { %v756_v19 = vmul.f32 -0.5, %v2660_v16  ;;  %1640 = vpow2.f32 %v641_v12  ;;  %v883_v20 = vmul.f32 0.6931472, %v1627_v8  ;;  %v749_v53 = vmul.f32 %v2628_v25, %v748_v1 }
 0x112   : > { %v1629_v18 = vpop.eup %1628  ;;  %1642 = vpow2.f32 %v643_v3  ;;  %v925_v14 = vmul.f32 0.5, %v909_v4  ;;  %v910_v21 = vmul.f32 %v2609_v58, %v2609_v58  ;;  %v544_v26 = vmax.f32 %v2513_v51, 0.0 }
 0x113   : > { %v1631_v27 = vpop.eup %1630  ;;  %v737_v44 = vmul.f32 0.6931472, %v1629_v18  ;;  %vm2679_vm6 = vcmp.lt.f32.partialorder %v750_v11, 0.0004427343  ;;  %1644 = vlog2.f32 %v814_v33  ;;  %vm559_vm7 = vcmp.ne.f32.partialorder %v2510_v49, %v2510_v49 }
 0x114   : > { %v1633_v24 = vpop.eup %1632  ;;  %vm560_vm8 = vcmp.ne.f32.partialorder %v2513_v51, %v2513_v51  ;;  %v757_v37 = vadd.f32 1.0, %v756_v19  ;;  %v954_v40 = vadd.f32 %v953_v38, %v939_v13  ;;  %v940_v47 = vadd.f32 %v924_v5, %v883_v20 }
 0x115   : > { %v2683_v29 = vpop.eup %1634  ;;  %v743_v25 = vsel %vm2670_vm5, %v740_v61, %v737_v44  ;;  %v746_v30 = vmul.f32 0.6931472, %v1633_v24  ;;  %v759_v33 = vand.u32 2147483647, %v2660_v16  ;;  %v885_v48 = vmul.f32 0.6931472, %v1631_v27 }
 0x116   : > { %v799_v58 = vadd.f32 %v743_v25, %v543_v17  ;;  %v762_v39 = vadd.f32 1.0, %v2683_v29  ;;  %v911_v41 = vmul.f32 %v2633_v34, %v2633_v34  ;;  %v765_v56 = vmul.f32 -0.5, %v2683_v29  ;;  %v513_v24 = vld [vmem:[%s2312_s24 + $0x60] sm:$0xff] }
 0x117   : > { %v752_v35 = vsel %vm2679_vm6, %v749_v53, %v746_v30  ;;  %v926_v57 = vmul.f32 0.5, %v910_v21  ;;  %v758_v10 = vmul.f32 %v2660_v16, %v757_v37  ;;  %v545_v60 = vmax.f32 %v2571_v9, 0.0 }
 0x118   : > { %v800_v55 = vadd.f32 %v752_v35, %v544_v26  ;;  %v815_v36 = vsel %vm559_vm7, %v2510_v49, %v799_v58  ;;  %1646 = vlog2.f32 %v762_v39  ;;  %v1637_v28 = vpop.eup %1636  ;;  %vm2709_vm9 = vcmp.lt.f32.partialorder %v759_v33, 0.0004427343  ;;  %v833_v35 = vld [vmem:[%s2304_s20 + $0x60] sm:$0xff] }
 0x119   : > { %v847_v50 = vmul.f32 %v815_v36, %v511_v32  ;;  %1648 = vlog2.f32 %v815_v36  ;;  %v941_v46 = vadd.f32 %v925_v14, %v885_v48  ;;  %v955_v0 = vadd.f32 %v954_v40, %v940_v47  ;;  %v514_v40 = vld [vmem:[%s2312_s24 + $0x68] sm:$0xff] }
 0x11a   : > { %v816_v59 = vsel %vm560_vm8, %v2513_v51, %v800_v55  ;;  %v1639_v49 = vpop.eup %1638  ;;  %vm561_vm10 = vcmp.ne.f32.partialorder %v2571_v9, %v2571_v9  ;;  %v887_v4 = vmul.f32 0.6931472, %v1637_v28  ;;  %v766_v5 = vadd.f32 1.0, %v765_v56 }
 0x11b   : > { %v848_v45 = vmul.f32 %v816_v59, %v512_v23  ;;  %v863_v15 = vadd.f32 %v847_v50, %v831_v52  ;;  %v1641_v63 = vpop.eup %1640  ;;  %v755_v51 = vmul.f32 0.6931472, %v1639_v49  ;;  %1650 = vlog2.f32 %v816_v59 }
 0x11c   : > { %v2715_v31 = vpop.eup %1642  ;;  %v771_v1 = vadd.f32 1.0, %v1641_v63  ;;  %v768_v8 = vand.u32 2147483647, %v2683_v29  ;;  %v927_v17 = vmul.f32 0.5, %v911_v41  ;;  %v546_v61 = vmax.f32 %v2580_v22, 0.0  ;;  %v834_v41 = vld [vmem:[%s2304_s20 + $0x68] sm:$0xff] }
 0x11d   : > { %v864_v16 = vadd.f32 %v848_v45, %v832_v42  ;;  %v761_v6 = vsel %vm2709_vm9, %v758_v10, %v755_v51  ;;  %v780_v11 = vadd.f32 1.0, %v2715_v31  ;;  %v1645_v12 = vpop.eup %1644  ;;  %v774_v18 = vmul.f32 -0.5, %v1641_v63 }
 0x11e   : > { %v801_v13 = vadd.f32 %v761_v6, %v545_v60  ;;  %1652 = vlog2.f32 %v771_v1  ;;  %v956_v38 = vadd.f32 %v955_v0, %v941_v46  ;;  %v767_v62 = vmul.f32 %v2683_v29, %v766_v5 }
 0x11f   : > { %v1422_v3 = vpack.c.bf16 %v864_v16, %v863_v15  ;;  %1654 = vlog2.f32 %v780_v11  ;;  %v783_v27 = vmul.f32 -0.5, %v2715_v31  ;;  %v889_v44 = vmul.f32 0.6931472, %v1645_v12  ;;  %v515_v16 = vld [vmem:[%s2312_s24 + $0x70] sm:$0xff]  ;;  %v516_v11 = vld [vmem:[%s2312_s24 + $0x78] sm:$0xff] }
 0x120   : > { %v817_v19 = vsel %vm561_vm10, %v2571_v9, %v801_v13  ;;  %v942_v53 = vadd.f32 %v926_v57, %v887_v4  ;;  %vm769_vm11 = vcmp.lt.f32.partialorder %v768_v8, 0.0004427343  ;;  %v912_v14 = vmul.f32 %v511_v32, %v511_v32 }
 0x121   : > { %1423 = vmatpush3.bf16.msra.mxu0 %v1422_v3  ;;  %1656 = vlog2.f32 %v817_v19  ;;  %v913_v21 = vmul.f32 %v512_v23, %v512_v23  ;;  %v775_v29 = vadd.f32 1.0, %v774_v18  ;;  %v777_v25 = vand.u32 2147483647, %v1641_v63  ;;  %v835_v18 = vld [vmem:[%s2304_s20 + $0x70] sm:$0xff] }
 0x122   : > { %v1647_v20 = vpop.eup %1646  ;;  %1424 = vmatprep.subr.bf16.mxu0 %v1960_v2  ;;  %vm562_vm12 = vcmp.ne.f32.partialorder %v2580_v22, %v2580_v22  ;;  %v849_v30 = vmul.f32 %v817_v19, %v513_v24  ;;  %v784_v58 = vadd.f32 1.0, %v783_v27  ;;  %v943_v37 = vadd.f32 %v927_v17, %v889_v44 }
 0x123   : > { %v764_v26 = vmul.f32 0.6931472, %v1647_v20  ;;  %v1649_v7 = vpop.eup %1648  ;;  %v957_v39 = vadd.f32 %v956_v38, %v942_v53  ;;  %v786_v33 = vand.u32 2147483647, %v2715_v31  ;;  %v928_v48 = vmul.f32 0.5, %v912_v14 }
 0x124   : > { %v891_v32 = vmul.f32 0.6931472, %v1649_v7  ;;  %v929_v23 = vmul.f32 0.5, %v913_v21  ;;  %v914_v55 = vmul.f32 %v513_v24, %v513_v24  ;;  %v547_v50 = vmax.f32 %v2649_v43, 0.0 }
 0x125   : > { %v770_v9 = vsel %vm769_vm11, %v767_v62, %v764_v26  ;;  %v1651_v36 = vpop.eup %1650  ;;  %v776_v56 = vmul.f32 %v1641_v63, %v775_v29  ;;  %vm2738_vm13 = vcmp.lt.f32.partialorder %v777_v25, 0.0004427343  ;;  %v865_v42 = vadd.f32 %v849_v30, %v833_v35  ;;  %v836_v62 = vld [vmem:[%s2304_s20 + $0x78] sm:$0xff] }
 0x126   : > { %v802_v47 = vadd.f32 %v770_v9, %v546_v61  ;;  %v785_v10 = vmul.f32 %v2715_v31, %v784_v58  ;;  %v958_v45 = vadd.f32 %v957_v39, %v943_v37  ;;  %v548_v15 = vmax.f32 %v2652_v54, 0.0 }
 0x127   : > { %vm2744_vm14 = vcmp.lt.f32.partialorder %v786_v33, 0.0004427343  ;;  %v893_v34 = vmul.f32 0.6931472, %v1651_v36  ;;  %v944_v63 = vadd.f32 %v928_v48, %v891_v32  ;;  %vm563_vm15 = vcmp.ne.f32.partialorder %v2649_v43, %v2649_v43 }
 0x128   : > { %v818_v52 = vsel %vm562_vm12, %v2580_v22, %v802_v47  ;;  %v1653_v57 = vpop.eup %1652  ;;  %vm564_vm0 = vcmp.ne.f32.partialorder %v2652_v54, %v2652_v54  ;;  %v915_v6 = vmul.f32 %v514_v40, %v514_v40  ;;  %v930_v8 = vmul.f32 0.5, %v914_v55 }
 0x129   : > { %v850_v59 = vmul.f32 %v818_v52, %v514_v40  ;;  %1658 = vlog2.f32 %v818_v52  ;;  %v1655_v49 = vpop.eup %1654  ;;  %v773_v22 = vmul.f32 0.6931472, %v1653_v57  ;;  %v945_v3 = vadd.f32 %v929_v23, %v893_v34  ;;  %v976_v57 = vld [vmem:[%s2338_s18] sm:$0xff] }
 0x12a   : > { %v782_v0 = vmul.f32 0.6931472, %v1655_v49  ;;  %v959_v13 = vadd.f32 %v958_v45, %v944_v63  ;;  %v931_v24 = vmul.f32 0.5, %v915_v6  ;;  %v916_v7 = vmul.f32 %v515_v16, %v515_v16  ;;  %v1053_v49 = vld [vmem:[%s491_s27] sm:$0x1] (!%p1348_p4) }
 0x12b   : > { %v866_v46 = vadd.f32 %v850_v59, %v834_v41  ;;  %v1657_v51 = vpop.eup %1656  ;;  %v779_v31 = vsel %vm2738_vm13, %v776_v56, %v773_v22  ;;  %v917_v29 = vmul.f32 %v516_v11, %v516_v11  ;;  %v1057_v45 = vand.u32 (!%p1348_p4), 2147483647, %v1053_v49 }
 0x12c   : > { %v788_v5 = vsel %vm2744_vm14, %v785_v10, %v782_v0  ;;  %v803_v1 = vadd.f32 %v779_v31, %v547_v50  ;;  %v895_v17 = vmul.f32 0.6931472, %v1657_v51  ;;  %v960_v53 = vadd.f32 %v959_v13, %v945_v3  ;;  %v869_v50 = vld [vmem:[#allocation2] sm:$0x1] }
 0x12d   : > { %v1425_v4 = vpack.c.bf16 %v866_v46, %v865_v42  ;;  %v804_v12 = vadd.f32 %v788_v5, %v548_v15  ;;  %v932_v9 = vmul.f32 0.5, %v916_v7  ;;  %v933_v58 = vmul.f32 0.5, %v917_v29  ;;  %v1073_v3 = vld [vmem:[%s488_s14] sm:$0x1] (!%p1348_p4) }
 0x12e   : > { %v819_v61 = vsel %vm563_vm15, %v2649_v43, %v803_v1  ;;  %v946_v14 = vadd.f32 %v930_v8, %v895_v17  ;;  %v1058_v15 = vsub.f32 (!%p1348_p4), 0.0, %v1057_v45  ;;  %v1078_v31 = vlaneseq (!%p1348_p4) }
 0x12f   : > { %1426 = vmatpush3.bf16.msra.mxu0 %v1425_v4  ;;  %v820_v38 = vsel %vm564_vm0, %v2652_v54, %v804_v12  ;;  %v851_v19 = vmul.f32 %v819_v61, %v515_v16  ;;  %1660 = vlog2.f32 %v819_v61  ;;  %v975_v54 = vld [vmem:[%s974_s16] sm:$0xff]  ;;  %v1054_v16 = vmax.f32 (!%p1348_p4), %v1053_v49, 0.0 }
 0x130   : > { %1427 = vmatprep.subr.bf16.mxu0 %v1960_v2  ;;  %v852_v27 = vmul.f32 %v820_v38, %v516_v11  ;;  %1662 = vlog2.f32 %v820_v38  ;;  %v961_v2 = vadd.f32 %v960_v53, %v946_v14  ;;  %v1059_v22 = vmul.f32 (!%p1348_p4), 1.442695, %v1058_v15  ;;  %v1072_v11 = vld [vmem:[%s494_s13] sm:$0x1] (!%p1348_p4) }
 0x131   : > { %v867_v20 = vadd.f32 %v851_v19, %v835_v18  ;;  %vm1055_vm2 = vcmp.ne.f32.partialorder (!%p1348_p4), %v1053_v49, %v1053_v49  ;;  %v1079_v6 = vshrl.u32 (!%p1348_p4), %v1078_v31, 7  ;;  %v1089_v19 = vmul.f32 (!%p1348_p4), %v1072_v11, %v1072_v11 }
 0x132   : > { %v868_v21 = vadd.f32 %v852_v27, %v836_v62  ;;  %1664 = vpow2.f32 (!%p1348_p4), %v1059_v22 }
 0x133   : > { %v1659_v44 = vpop.eup %1658  ;;  %v1080_v17 = vsub.s32 (!%p1348_p4), 0, %v1079_v6  ;;  %v1090_v53 = vmul.f32 (!%p1348_p4), 0.5, %v1089_v19 }
 0x134   : > { %v897_v26 = vmul.f32 0.6931472, %v1659_v44  ;;  %v1428_v43 = vpack.c.bf16 %v868_v21, %v867_v20 }
 0x136   : > { %v947_v25 = vadd.f32 %v931_v24, %v897_v26  ;;  %1429 = vmatpush3.bf16.msra.mxu0 %v1428_v43 }
 0x138   : > { %v962_v39 = vadd.f32 %v961_v2, %v947_v25 }
 0x139   : > { %v1661_v30 = vpop.eup %1660  ;;  %1404 = vmatmul.mubr.f32.vlgmr.msra.gmra.mrb[0].mxu0 %v975_v54 }
 0x13a   : > { %v1663_v37 = vpop.eup %1662  ;;  %v899_v40 = vmul.f32 0.6931472, %v1661_v30 }
 0x13b   : > { %v901_v47 = vmul.f32 0.6931472, %v1663_v37 }
 0x13c   : > { %v948_v35 = vadd.f32 %v932_v9, %v899_v40  ;;  %v1665_v60 = vpop.eup (!%p1348_p4), %1664 }
 0x13d   : > { %v949_v33 = vadd.f32 %v933_v58, %v901_v47  ;;  %v1061_v34 = vadd.f32 (!%p1348_p4), 1.0, %v1665_v60  ;;  %v1064_v63 = vmul.f32 (!%p1348_p4), -0.5, %v1665_v60  ;;  %v1067_v0 = vand.u32 (!%p1348_p4), 2147483647, %v1665_v60 }
 0x13e   : > { %v963_v32 = vadd.f32 %v962_v39, %v948_v35 }
 0x13f   : > { %1666 = vlog2.f32 (!%p1348_p4), %v1061_v34  ;;  %v1065_v46 = vadd.f32 (!%p1348_p4), 1.0, %v1064_v63  ;;  %vm1068_vm1 = vcmp.lt.f32.partialorder (!%p1348_p4), %v1067_v0, 0.0004427343 }
 0x140   : > { %v964_v48 = vadd.f32 %v963_v32, %v949_v33 }
 0x141   : > { %v1066_v51 = vmul.f32 (!%p1348_p4), %v1665_v60, %v1065_v46 }
 0x142   : > { %v965_v23 = vrot.slane %v964_v48, 4 }
 0x144   : > { %v966_v55 = vadd.f32 %v965_v23, %v964_v48 }
 0x146   : > { %v967_v36 = vrot.slane %v966_v55, 2 }
 0x148   : > { %v968_v52 = vadd.f32 %v967_v36, %v966_v55 }
 0x149   : > { %v1667_v4 = vpop.eup (!%p1348_p4), %1666 }
 0x14a   : > { %v969_v41 = vrot.slane %v968_v52, 1  ;;  %v1063_v5 = vmul.f32 (!%p1348_p4), 0.6931472, %v1667_v4 }
 0x14c   : > { %v970_v56 = vadd.f32 %v969_v41, %v968_v52  ;;  %v1069_v1 = vsel (!%p1348_p4), %vm1068_vm1, %v1066_v51, %v1063_v5 }
 0x14d   : > { %v1070_v8 = vadd.f32 (!%p1348_p4), %v1069_v1, %v1054_v16 }
 0x14e   : > { %v971_v28 = vadd.f32 %v970_v56, %v869_v50 }
 0x14f   : > { %v1071_v12 = vsel (!%p1348_p4), %vm1055_vm2, %v1053_v49, %v1070_v8 }
 0x150   : > { %972 = vst [vmem:[#allocation2] sm:$0x1] %v971_v28  ;;  %v1074_v13 = vmul.f32 (!%p1348_p4), %v1072_v11, %v1071_v12  ;;  %1668 = vlog2.f32 (!%p1348_p4), %v1071_v12 }
 0x152   : > { %v1075_v61 = vadd.f32 (!%p1348_p4), %v1074_v13, %v1073_v3 }
 0x154   : > { %v1081_v38 = vrot.slane (!%p1348_p4), %v1075_v61, %v1080_v17 }
 0x157   : > { %v1085_v20 = vld [vmem:[#allocation2] sm:$0x1] (!%p1348_p4) }
 0x15a   : > { %v1669_v27 = vpop.eup (!%p1348_p4), %1668 }
 0x15b   : > { %v1087_v44 = vmul.f32 (!%p1348_p4), 0.6931472, %v1669_v27 }
 0x15d   : > { %v1088_v24 = vadd.f32 (!%p1348_p4), %v1087_v44, %v1085_v20 }
 0x15f   : > { %v1091_v14 = vadd.f32 (!%p1348_p4), %v1090_v53, %v1088_v24 }
 0x161   : > { %1092 = vst [vmem:[%s482_s5] sm:$0x1] (!%p1348_p4), %v1091_v14 }
 0x209   : > { %1052 = sbr.rel (%p1348_p4) target bundleno = 538 (0x21a), region = 72 }
 0x20c   : > { %v1043_v59 = vpop.f32.mrb[0].mxu0 }
 0x20d   : > { %v1047_v42 = vadd.f32 %v1043_v59, %v976_v57  ;;  %v1405_v10 = vpop.f32.mrb[1].mxu0 }
 0x20f   : > { %1048 = vst [vmem:[%s2338_s18] sm:$0xff] %v1047_v42 }
 0x216   : > { %v1076_v18 = vld [vmem:[%s2338_s18] sm:$0xff] }
 0x217   : > { %v1083_v62 = vadd.f32 %v1081_v38, %v1076_v18 }
 0x219   : > { %1084 = vst [vmem:[%s2338_s18] sm:$0xff] %v1083_v62 }
 0x21a PF: > { %s1350_s17 = sshll.u32 %s1938_s12, 7  ;;  %s2982_s25 = sld [smem:[#allocation33_spill]] }
 0x21b   : > { %s1111_s23 = sshll.u32 %s2338_s18, 4  ;;  %s1094_s13 = scalar_lea.sflag [#allocation5], %s2319_s21  ;;  %s1112_s23 = int_to_ptr.vmem [resolvable:$true] %s1111_s23 }
 0x21c   : > { %s1788_s6 = scalar_lea.vmem %s1112_s23, 128  ;;  %p2983_p9 = scmp.ne.s32.totalorder %s2929_s30, 0 }
 0x21d   : > { %p1789_p5 = scmp.ne.s32.totalorder %s1112_s23, %s1788_s6  ;;  %s1963_s29 = smov [#allocation11]  }
 0x21e   : > { %s1792_s22 = sshll.u32 %s1963_s29, 4  ;;  %s1793_s22 = int_to_ptr.vmem [resolvable:$false] %s1792_s22 }
 0x21f   : > { %p1790_p13 = pnand %p1789_p5, %p2983_p9  ;;  %s1794_s16 = scalar_lea.vmem %s1793_s22, 256 }
 0x220   : > { %s2790_s8 = scalar_lea.hbm %s2982_s25, %s1350_s17  ;;  %p1795_p12 = scmp.lt.s32.totalorder %s1112_s23, %s1793_s22 }
 0x221   : > { %p1791_p8 = pneg %p1790_p13  ;;  %p1796_p11 = scmp.lt.s32.totalorder %s1794_s16, %s1788_s6 }
 0x223   : > { %p1797_p2 = por %p1796_p11, %p1795_p12 }
 0x225   : > { %p1798_p10 = pnand %p1797_p2, %p1791_p8 }
 0x227   : > { %1801 = shalt.err (!%p1798_p10)
}
 0x228   : > { %s1802_s18 = scalar_lea.hbm %s2790_s8, 128  ;;  %s1806_s19 = scalar_lea.hbm %s2982_s25, 384 }
 0x229   : > { %p1803_p0 = scmp.ne.s32.totalorder %s2790_s8, %s1802_s18  ;;  %p1807_p7 = scmp.lt.u32.totalorder %s2790_s8, %s2982_s25 }
 0x22a   : > { %p1808_p1 = scmp.lt.u32.totalorder %s1806_s19, %s1802_s18  ;;  %p1810_p5 = scmp.lt.u32.totalorder %s1802_s18, %s2790_s8 }
 0x22b   : > { %p1804_p6 = pnand %p1803_p0, %p2983_p9 }
 0x22c   : > { %p1809_p4 = por %p1808_p1, %p1807_p7 }
 0x22d   : > { %p1805_p3 = pneg %p1804_p6 }
 0x22e   : > { %p1811_p13 = por %p1810_p5, %p1809_p4 }
 0x230   : > { %p1812_p8 = pnand %p1811_p13, %p1805_p3 }
 0x232   : > { %1815 = shalt.err (!%p1812_p8)
}
 0x233   : > { %1443 = dma.vmem_to_hbm [thread:$0]  (%p2983_p9), %s1112_s23, 128, %s2790_s8, %s1094_s13  }
 0x234   : > { %s1351_s1 = sshll.u32 %s1938_s12, 4  ;;  %s1124_s7 = sshll.u32 %s482_s5, 4  ;;  %s1125_s7 = int_to_ptr.vmem [resolvable:$true] %s1124_s7 }
 0x235   : > { %s2984_s14 = sld [smem:[#allocation34_spill]]  ;;  %s1099_s29 = scalar_lea.sflag [#allocation13], %s2319_s21 }
 0x236   : > { %s1816_s22 = scalar_lea.vmem %s1125_s7, 16  ;;  %s1964_s16 = smov [#allocation12]  }
 0x237   : > { %p1817_p12 = scmp.ne.s32.totalorder %s1125_s7, %s1816_s22  ;;  %s1820_s18 = sshll.u32 %s1964_s16, 4  ;;  %s1821_s18 = int_to_ptr.vmem [resolvable:$false] %s1820_s18 }
 0x238   : > { %s1822_s20 = scalar_lea.vmem %s1821_s18, 32  ;;  %p1823_p10 = scmp.lt.s32.totalorder %s1125_s7, %s1821_s18 }
 0x239   : > { %p1818_p11 = pnand %p1817_p12, %p2983_p9  ;;  %p1824_p0 = scmp.lt.s32.totalorder %s1822_s20, %s1816_s22 }
 0x23b   : > { %s2985_s6 = smov %s2984_s14  ;;  %s2817_s27 = scalar_lea.hbm %s2984_s14, %s1351_s1 }
 0x23c   : > { %p1819_p2 = pneg %p1818_p11  ;;  %p1825_p6 = por %p1824_p0, %p1823_p10 }
 0x23e   : > { %p1826_p3 = pnand %p1825_p6, %p1819_p2 }
 0x240   : > { %1829 = shalt.err (!%p1826_p3)
}
 0x241   : > { %s1830_s12 = scalar_lea.hbm %s2817_s27, 16  ;;  %s1834_s8 = scalar_lea.hbm %s2985_s6, 48 }
 0x242   : > { %p1831_p7 = scmp.ne.s32.totalorder %s2817_s27, %s1830_s12  ;;  %p1835_p5 = scmp.lt.u32.totalorder %s2817_s27, %s2985_s6 }
 0x243   : > { %p1836_p13 = scmp.lt.u32.totalorder %s1834_s8, %s1830_s12  ;;  %p1838_p12 = scmp.lt.u32.totalorder %s1830_s12, %s2817_s27 }
 0x244   : > { %p1832_p1 = pnand %p1831_p7, %p2983_p9 }
 0x245   : > { %p1837_p8 = por %p1836_p13, %p1835_p5 }
 0x246   : > { %p1833_p4 = pneg %p1832_p1 }
 0x247   : > { %p1839_p11 = por %p1838_p12, %p1837_p8 }
 0x249   : > { %p1840_p2 = pnand %p1839_p11, %p1833_p4 }
 0x24b   : > { %1843 = shalt.err (!%p1840_p2)
}
 0x24c   : > { %1444 = dma.vmem_to_hbm [thread:$0]  (%p2983_p9), %s1125_s7, 16, %s2817_s27, %s1099_s29  }
 0x24d PF: > { %s2986_s24 = sld [smem:[#allocation19_spill]]  ;;  %s2987_s19 = sld [smem:[#allocation28_spill]] }
 0x24e   : > { %p1471_p10 = scmp.ge.s32.totalorder %s1950_s15, 2 }
 0x253   : > { %s1136_s11 = sand.u32 1, %s2986_s24   ;;  %p2988_p0 = scmp.ne.s32.totalorder %s2987_s19, 0 }
 0x254   : > { %s1137_s26 = scalar_lea.sflag [#allocation5], %s1136_s11 }
 0x255   : > { %p1462_p6 = pnand %p1471_p10, %p2988_p0 }
 0x257   : > { %1901 = dma.done.wait (!%p1462_p6), %s1137_s26, 128  }
 0x258   : > { %1903 = vsyncadd (!%p1462_p6), %s1137_s26, 4294967168  ;;  %s1146_s1 = scalar_lea.sflag [#allocation13], %s1136_s11 }
 0x259   : > { %1905 = dma.done.wait (!%p1462_p6), %s1146_s1, 16  }
 0x25a   : > { %1907 = vsyncadd (!%p1462_p6), %s1146_s1, 4294967280  ;;  %s32_s15 = sadd.s32 1, %s1950_s15   ;;  %s2989_s30 = sld [smem:[#allocation20_spill]] }
 0x25b   : > { %p29_p3 = scmp.ge.s32.totalorder %s32_s15, 8   ;;  %s2990_s29 = sld [smem:[#allocation27_spill]] }
 0x25c   : > { %s2991_s7 = sld [smem:[#allocation26_spill]]  ;;  %s2992_s11 = sld [smem:[#allocation22_spill]] }
 0x25d   : > { %s2993_s12 = sld [smem:[#allocation23_spill]]  ;;  %s2994_s13 = sld [smem:[#allocation24_spill]] }
 0x25e   : > { %s2995_s14 = sld [smem:[#allocation25_spill]]  ;;  %s2996_s27 = smov %s1914_s28 }
 0x25f   :  { %31 = sbr.rel (!%p29_p3) target bundleno = 21 (0x15), region = 157 }
 0x260   : > { %s2997_s28 = smov %s2989_s30  ;;  %s2998_s30 = smov %s1926_s9 }
 0x261   : > { %s2999_s9 = smov %s1930_s10 }
 0x262   : > { %s3000_s10 = smov %s2991_s7 }
 0x266   :  { %1150 = vsyncpa [#allocation4], 1 }
 0x267   :  { %1152 = vsyncpa [#allocation4 + $0x1], 1 }
 0x268   :  { %1153 = vsyncpa [#allocation7], 1 }
 0x269   :  { %1155 = vsyncpa [#allocation7 + $0x1], 1 }
 0x26a   :  { %1156 = vsyncpa [#allocation10], 1 }
 0x26b   :  { %1158 = vsyncpa [#allocation10 + $0x1], 1 }
 0x26c   :  { %1159 = vsyncpa [#allocation5], 1 }
 0x26d   :  { %1161 = vsyncpa [#allocation5 + $0x1], 1 }
 0x26e   :  { %1162 = vsyncpa [#allocation13], 1 }
 0x26f   :  { %1164 = vsyncpa [#allocation13 + $0x1], 1 }

</bundles_post_ra>
